<compile_context>
chip_gen: v5e
topology: v5e:2x2
jax: 0.10.0
libtpu: 0.0.40
codegen_flags: <defaults>
</compile_context>

<pallas_src>
import functools

import jax
import jax.numpy as jnp
from jax import lax
from jax.experimental import pallas as pl
from jax.experimental.pallas import tpu as pltpu


_DIMS = [(9, 128), (128, 256), (256, 128), (128, 9)]


def dqn_kernel(x_ref,
               w1_ref, b1_ref,
               w2_ref, b2_ref,
               w3_ref, b3_ref,
               w4_ref, b4_ref,
               o_ref,
               *, compute_dtype, act_dtype, precision):
    # x arrives in f32; cast to the MXU compute dtype on-chip.
    x = x_ref[...].astype(compute_dtype)

    def linear(h, w_ref, b_ref):
        acc = jnp.dot(h, w_ref[...], preferred_element_type=jnp.float32,
                      precision=precision)
        return acc.astype(act_dtype) + b_ref[...]

    # fc1 + tanh
    h1 = jnp.tanh(linear(x, w1_ref, b1_ref)).astype(compute_dtype)

    # fc2 + tanh
    h2 = jnp.tanh(linear(h1, w2_ref, b2_ref))
    # dropout(p=0.2): identity in eval/inference mode.
    # TODO(synk): training-mode dropout via pltpu.prng_seed + prng_random_bits mask.
    h2 = h2.astype(compute_dtype)

    # fc3 + tanh
    h3 = jnp.tanh(linear(h2, w3_ref, b3_ref)).astype(compute_dtype)

    # fc4 (no activation): f32 bias, f32 output.
    acc4 = jnp.dot(h3, w4_ref[...], preferred_element_type=jnp.float32,
                   precision=precision)
    o_ref[...] = (acc4 + b4_ref[...]).astype(o_ref.dtype)


def _round_up(n, m):
    return ((n + m - 1) // m) * m


def _cdiv(a, b):
    return -(-a // b)


def _default_act_dtype(compute_dtype):
    """bf16 activations only where the VPU/EUP support bf16 (v6e / v7x)."""
    if jnp.dtype(compute_dtype) != jnp.dtype(jnp.bfloat16):
        return jnp.float32
    try:
        kind = jax.devices()[0].device_kind.lower()
    except Exception:
        return jnp.float32
    if "v6" in kind or "v7" in kind:
        return jnp.bfloat16
    return jnp.float32  # v5e and older: no bf16 VPU/EUP -> keep f32 activation math.


def prepare_params(params, *, compute_dtype=jnp.bfloat16, act_dtype=None):
    """Cast weights/biases once, outside the jitted per-step forward call."""
    if act_dtype is None:
        act_dtype = _default_act_dtype(compute_dtype)
    prepared = {
        "w1": params["w1"].astype(compute_dtype),
        "w2": params["w2"].astype(compute_dtype),
        "w3": params["w3"].astype(compute_dtype),
        "w4": params["w4"].astype(compute_dtype),
        "b1": params["b1"].astype(act_dtype),
        "b2": params["b2"].astype(act_dtype),
        "b3": params["b3"].astype(act_dtype),
        "b4": params["b4"].astype(jnp.float32),  # final bias stays f32
    }
    return prepared, act_dtype


@functools.partial(jax.jit, static_argnames=("tile_b", "compute_dtype", "act_dtype"))
def dqn_forward(x, params, *, tile_b=1024, compute_dtype=jnp.bfloat16,
                act_dtype=jnp.bfloat16):
    """x: (B, 9) float32. params: pre-cast dict from prepare_params.

    Returns (B, 9) float32 Q-values.
    """
    B, in_dim = x.shape
    out_dim = params["w4"].shape[1]

    # Batch tile: aligned for sublane packing (16 rows for bf16, 8 for f32),
    # at most tile_b rows per step, and >=2 grid steps for moderate B so the
    # "parallel" axis can shard across both v7x TensorCores.
    align = 16 if jnp.dtype(compute_dtype).itemsize == 2 else 8
    if B >= 32:
        TB = min(tile_b, _round_up(_cdiv(B, 2), align))
    else:
        TB = min(tile_b, _round_up(B, align))
    B_pad = _round_up(B, TB)
    if B_pad != B:
        x = jnp.pad(x, ((0, B_pad - B), (0, 0)))

    grid = (B_pad // TB,)

    def resident_spec(shape):
        # Whole (small) array as one block with a constant index map:
        # stays VMEM-resident, no per-step re-DMA.
        return pl.BlockSpec(shape, lambda i: (0,) * len(shape))

    flops = 2 * B_pad * sum(fi * fo for fi, fo in _DIMS)
    transcendentals = B_pad * (128 + 256 + 128)
    bytes_weights = sum(int(params[k].size) * jnp.dtype(params[k].dtype).itemsize
                        for k in params)
    bytes_accessed = B_pad * in_dim * 4 + B_pad * out_dim * 4 + bytes_weights

    kernel = functools.partial(
        dqn_kernel,
        compute_dtype=compute_dtype,
        act_dtype=act_dtype,
        precision=(lax.Precision.HIGHEST
                   if jnp.dtype(compute_dtype) == jnp.dtype(jnp.float32)
                   else None),
    )

    out = pl.pallas_call(
        kernel,
        out_shape=jax.ShapeDtypeStruct((B_pad, out_dim), jnp.float32),
        grid=grid,
        in_specs=[
            pl.BlockSpec((TB, in_dim), lambda i: (i, 0)),
            resident_spec(params["w1"].shape), resident_spec(params["b1"].shape),
            resident_spec(params["w2"].shape), resident_spec(params["b2"].shape),
            resident_spec(params["w3"].shape), resident_spec(params["b3"].shape),
            resident_spec(params["w4"].shape), resident_spec(params["b4"].shape),
        ],
        out_specs=pl.BlockSpec((TB, out_dim), lambda i: (i, 0)),
        compiler_params=pltpu.CompilerParams(
            dimension_semantics=("parallel",),
        ),
        cost_estimate=pl.CostEstimate(
            flops=flops,
            transcendentals=transcendentals,
            bytes_accessed=bytes_accessed,
        ),
    )(x, params["w1"], params["b1"], params["w2"], params["b2"],
      params["w3"], params["b3"], params["w4"], params["b4"])

    return out[:B]


def init_params(key):
    """Deterministic init matching nn.Linear default: U(-1/sqrt(fan_in), 1/sqrt(fan_in))."""
    params = {}
    keys = jax.random.split(key, 2 * len(_DIMS))
    for i, (fan_in, fan_out) in enumerate(_DIMS):
        bound = 1.0 / jnp.sqrt(fan_in)
        params[f"w{i+1}"] = jax.random.uniform(
            keys[2 * i], (fan_in, fan_out), jnp.float32, -bound, bound)
        params[f"b{i+1}"] = jax.random.uniform(
            keys[2 * i + 1], (1, fan_out), jnp.float32, -bound, bound)
    return params


def dqn_reference(x, params):
    h = jnp.tanh(x @ params["w1"] + params["b1"])
    h = jnp.tanh(h @ params["w2"] + params["b2"])
    h = jnp.tanh(h @ params["w3"] + params["b3"])
    return h @ params["w4"] + params["b4"]


if __name__ == "__main__":
    key = jax.random.PRNGKey(0)
    pkey, xkey, x2key = jax.random.split(key, 3)
    params = init_params(pkey)

    batch = 8
    x = jax.random.normal(xkey, (batch, 9), jnp.float32)
    ref = dqn_reference(x, params)

    # f32 compute path (strict check vs reference; HIGHEST-precision MXU).
    p_f32, act_f32 = prepare_params(params, compute_dtype=jnp.float32)
    out_f32 = jax.block_until_ready(
        dqn_forward(x, p_f32, compute_dtype=jnp.float32, act_dtype=act_f32))
    assert out_f32.shape == (batch, 9)
    assert jnp.allclose(out_f32, ref, atol=1e-4, rtol=1e-4)

    # bf16 MXU path (default inference config; activations bf16 on v6e/v7x, f32 on v5e).
    p_bf16, act_bf16 = prepare_params(params, compute_dtype=jnp.bfloat16)
    out_bf16 = jax.block_until_ready(
        dqn_forward(x, p_bf16, compute_dtype=jnp.bfloat16, act_dtype=act_bf16))
    assert out_bf16.shape == (batch, 9)
    assert jnp.allclose(out_bf16, ref, atol=5e-2, rtol=5e-2)

    # Multi-tile grid path (exercises batch padding and >=2 grid steps).
    batch2 = 100
    x2 = jax.random.normal(x2key, (batch2, 9), jnp.float32)
    ref2 = dqn_reference(x2, params)
    out2 = jax.block_until_ready(
        dqn_forward(x2, p_bf16, compute_dtype=jnp.bfloat16, act_dtype=act_bf16))
    assert out2.shape == (batch2, 9)
    assert jnp.allclose(out2, ref2, atol=5e-2, rtol=5e-2)

    print("KERNEL_OK")
</pallas_src>

<mosaic_0001>
module attributes {stable_mosaic.version = 11 : i64} {
  func.func @dqn_kernel(%arg0: i32, %arg1: memref<8x9xf32, #tpu.memory_space<vmem>>, %arg2: memref<9x128xf32, #tpu.memory_space<vmem>>, %arg3: memref<1x128xf32, #tpu.memory_space<vmem>>, %arg4: memref<128x256xf32, #tpu.memory_space<vmem>>, %arg5: memref<1x256xf32, #tpu.memory_space<vmem>>, %arg6: memref<256x128xf32, #tpu.memory_space<vmem>>, %arg7: memref<1x128xf32, #tpu.memory_space<vmem>>, %arg8: memref<128x9xf32, #tpu.memory_space<vmem>>, %arg9: memref<1x9xf32, #tpu.memory_space<vmem>>, %arg10: memref<8x9xf32, #tpu.memory_space<vmem>>) attributes {dimension_semantics = [#tpu.dimension_semantics<parallel>], iteration_bounds = array<i64: 1>, scalar_prefetch = 0 : i64, scratch_operands = 0 : i64, tpu.core_type = #tpu.core_type<tc>, window_params = [{transform_indices = @transform_0, window_bounds = array<i64: 8, 9>}, {pipeline_mode = #tpu.pipeline_mode<synchronous>, transform_indices = @transform_1, window_bounds = array<i64: 9, 128>}, {pipeline_mode = #tpu.pipeline_mode<synchronous>, transform_indices = @transform_2, window_bounds = array<i64: 1, 128>}, {pipeline_mode = #tpu.pipeline_mode<synchronous>, transform_indices = @transform_3, window_bounds = array<i64: 128, 256>}, {pipeline_mode = #tpu.pipeline_mode<synchronous>, transform_indices = @transform_4, window_bounds = array<i64: 1, 256>}, {pipeline_mode = #tpu.pipeline_mode<synchronous>, transform_indices = @transform_5, window_bounds = array<i64: 256, 128>}, {pipeline_mode = #tpu.pipeline_mode<synchronous>, transform_indices = @transform_6, window_bounds = array<i64: 1, 128>}, {pipeline_mode = #tpu.pipeline_mode<synchronous>, transform_indices = @transform_7, window_bounds = array<i64: 128, 9>}, {pipeline_mode = #tpu.pipeline_mode<synchronous>, transform_indices = @transform_8, window_bounds = array<i64: 1, 9>}, {transform_indices = @transform_9, window_bounds = array<i64: 8, 9>}]} {
    %c0 = arith.constant 0 : index
    %c0_0 = arith.constant 0 : index
    %0 = vector.load %arg1[%c0, %c0_0] : memref<8x9xf32, #tpu.memory_space<vmem>>, vector<8x9xf32>
    %c0_1 = arith.constant 0 : index
    %c0_2 = arith.constant 0 : index
    %1 = vector.load %arg2[%c0_1, %c0_2] : memref<9x128xf32, #tpu.memory_space<vmem>>, vector<9x128xf32>
    %cst = arith.constant dense<0.000000e+00> : vector<8x128xf32>
    %2 = tpu.matmul %0, %1, %cst {dimension_numbers = #tpu.dot_dimension_numbers<[1], [0], [0], [1], [0, 0, 1, 1], [], []>, precision = #tpu.contract_precision<fp32>} : vector<8x9xf32>, vector<9x128xf32>, vector<8x128xf32> -> vector<8x128xf32>
    %c0_3 = arith.constant 0 : index
    %c0_4 = arith.constant 0 : index
    %3 = vector.load %arg3[%c0_3, %c0_4] : memref<1x128xf32, #tpu.memory_space<vmem>>, vector<1x128xf32>
    %4 = vector.broadcast %3 : vector<1x128xf32> to vector<8x128xf32>
    %5 = arith.addf %2, %4 : vector<8x128xf32>
    %6 = math.tanh %5 : vector<8x128xf32>
    %c0_5 = arith.constant 0 : index
    %c0_6 = arith.constant 0 : index
    %7 = vector.load %arg4[%c0_5, %c0_6] : memref<128x256xf32, #tpu.memory_space<vmem>>, vector<128x256xf32>
    %cst_7 = arith.constant dense<0.000000e+00> : vector<8x256xf32>
    %8 = tpu.matmul %6, %7, %cst_7 {dimension_numbers = #tpu.dot_dimension_numbers<[1], [0], [0], [1], [0, 0, 1, 1], [], []>, precision = #tpu.contract_precision<fp32>} : vector<8x128xf32>, vector<128x256xf32>, vector<8x256xf32> -> vector<8x256xf32>
    %c0_8 = arith.constant 0 : index
    %c0_9 = arith.constant 0 : index
    %9 = vector.load %arg5[%c0_8, %c0_9] : memref<1x256xf32, #tpu.memory_space<vmem>>, vector<1x256xf32>
    %10 = vector.broadcast %9 : vector<1x256xf32> to vector<8x256xf32>
    %11 = arith.addf %8, %10 : vector<8x256xf32>
    %12 = math.tanh %11 : vector<8x256xf32>
    %c0_10 = arith.constant 0 : index
    %c0_11 = arith.constant 0 : index
    %13 = vector.load %arg6[%c0_10, %c0_11] : memref<256x128xf32, #tpu.memory_space<vmem>>, vector<256x128xf32>
    %cst_12 = arith.constant dense<0.000000e+00> : vector<8x128xf32>
    %14 = tpu.matmul %12, %13, %cst_12 {dimension_numbers = #tpu.dot_dimension_numbers<[1], [0], [0], [1], [0, 0, 1, 1], [], []>, precision = #tpu.contract_precision<fp32>} : vector<8x256xf32>, vector<256x128xf32>, vector<8x128xf32> -> vector<8x128xf32>
    %c0_13 = arith.constant 0 : index
    %c0_14 = arith.constant 0 : index
    %15 = vector.load %arg7[%c0_13, %c0_14] : memref<1x128xf32, #tpu.memory_space<vmem>>, vector<1x128xf32>
    %16 = vector.broadcast %15 : vector<1x128xf32> to vector<8x128xf32>
    %17 = arith.addf %14, %16 : vector<8x128xf32>
    %18 = math.tanh %17 : vector<8x128xf32>
    %c0_15 = arith.constant 0 : index
    %c0_16 = arith.constant 0 : index
    %19 = vector.load %arg8[%c0_15, %c0_16] : memref<128x9xf32, #tpu.memory_space<vmem>>, vector<128x9xf32>
    %cst_17 = arith.constant dense<0.000000e+00> : vector<8x9xf32>
    %20 = tpu.matmul %18, %19, %cst_17 {dimension_numbers = #tpu.dot_dimension_numbers<[1], [0], [0], [1], [0, 0, 1, 1], [], []>, precision = #tpu.contract_precision<fp32>} : vector<8x128xf32>, vector<128x9xf32>, vector<8x9xf32> -> vector<8x9xf32>
    %c0_18 = arith.constant 0 : index
    %c0_19 = arith.constant 0 : index
    %21 = vector.load %arg9[%c0_18, %c0_19] : memref<1x9xf32, #tpu.memory_space<vmem>>, vector<1x9xf32>
    %22 = vector.broadcast %21 : vector<1x9xf32> to vector<8x9xf32>
    %23 = arith.addf %20, %22 : vector<8x9xf32>
    %c0_20 = arith.constant 0 : index
    %c0_21 = arith.constant 0 : index
    %24 = vector.load %arg10[%c0_20, %c0_21] : memref<8x9xf32, #tpu.memory_space<vmem>>, vector<8x9xf32>
    tpu.vector_store %arg10[%c0_20, %c0_21], %23 {strides = array<i32>} : memref<8x9xf32, #tpu.memory_space<vmem>>, vector<8x9xf32>,
    return
  }
  func.func @transform_0(%arg0: i32) -> (i32, i32) {
    %c0_i32 = arith.constant 0 : i32
    %c0_i32_0 = arith.constant 0 : i32
    return %arg0, %c0_i32 : i32, i32
  }
  func.func @transform_1(%arg0: i32) -> (i32, i32) {
    %c0_i32 = arith.constant 0 : i32
    %c0_i32_0 = arith.constant 0 : i32
    %c0_i32_1 = arith.constant 0 : i32
    return %c0_i32, %c0_i32_0 : i32, i32
  }
  func.func @transform_2(%arg0: i32) -> (i32, i32) {
    %c0_i32 = arith.constant 0 : i32
    %c0_i32_0 = arith.constant 0 : i32
    %c0_i32_1 = arith.constant 0 : i32
    return %c0_i32, %c0_i32_0 : i32, i32
  }
  func.func @transform_3(%arg0: i32) -> (i32, i32) {
    %c0_i32 = arith.constant 0 : i32
    %c0_i32_0 = arith.constant 0 : i32
    %c0_i32_1 = arith.constant 0 : i32
    return %c0_i32, %c0_i32_0 : i32, i32
  }
  func.func @transform_4(%arg0: i32) -> (i32, i32) {
    %c0_i32 = arith.constant 0 : i32
    %c0_i32_0 = arith.constant 0 : i32
    %c0_i32_1 = arith.constant 0 : i32
    return %c0_i32, %c0_i32_0 : i32, i32
  }
  func.func @transform_5(%arg0: i32) -> (i32, i32) {
    %c0_i32 = arith.constant 0 : i32
    %c0_i32_0 = arith.constant 0 : i32
    %c0_i32_1 = arith.constant 0 : i32
    return %c0_i32, %c0_i32_0 : i32, i32
  }
  func.func @transform_6(%arg0: i32) -> (i32, i32) {
    %c0_i32 = arith.constant 0 : i32
    %c0_i32_0 = arith.constant 0 : i32
    %c0_i32_1 = arith.constant 0 : i32
    return %c0_i32, %c0_i32_0 : i32, i32
  }
  func.func @transform_7(%arg0: i32) -> (i32, i32) {
    %c0_i32 = arith.constant 0 : i32
    %c0_i32_0 = arith.constant 0 : i32
    %c0_i32_1 = arith.constant 0 : i32
    return %c0_i32, %c0_i32_0 : i32, i32
  }
  func.func @transform_8(%arg0: i32) -> (i32, i32) {
    %c0_i32 = arith.constant 0 : i32
    %c0_i32_0 = arith.constant 0 : i32
    %c0_i32_1 = arith.constant 0 : i32
    return %c0_i32, %c0_i32_0 : i32, i32
  }
  func.func @transform_9(%arg0: i32) -> (i32, i32) {
    %c0_i32 = arith.constant 0 : i32
    %c0_i32_0 = arith.constant 0 : i32
    return %arg0, %c0_i32 : i32, i32
  }
}

</mosaic_0001>

<bundles_post_ra>
// kernel: dqn_forward.1
= control target key start
LH: loop header
LB: loop body
LE: loop exit
PB: predicated region body
PF: predicated region fallthrough
CT: control target
= control target key end

     0   :  { %14 = vsyncpa [#allocation3], 0  ;;  %s3519_s0 = inlined_call_operand.vmem [shape: f32[8,9], index: 0, kind: input, shape index: {}]   ;;  %s3520_s1 = inlined_call_operand.vmem [shape: f32[9,128], index: 1, kind: input, shape index: {}]   ;;  %s3521_s2 = inlined_call_operand.vmem [shape: f32[1,128], index: 2, kind: input, shape index: {}]   ;;  %s3522_s3 = inlined_call_operand.hbm [shape: f32[128,256], index: 3, kind: input, shape index: {}]   ;;  %s3523_s4 = inlined_call_operand.vmem [shape: f32[1,256], index: 4, kind: input, shape index: {}]   ;;  %s3524_s5 = inlined_call_operand.hbm [shape: f32[256,128], index: 5, kind: input, shape index: {}]   ;;  %s3525_s6 = inlined_call_operand.vmem [shape: f32[1,128], index: 6, kind: input, shape index: {}]   ;;  %s3526_s7 = inlined_call_operand.vmem [shape: f32[128,9], index: 7, kind: input, shape index: {}]   ;;  %s3527_s8 = inlined_call_operand.vmem [shape: f32[1,9], index: 8, kind: input, shape index: {}]   ;;  %s3528_s9 = inlined_call_operand.hbm [shape: f32[8,9], index: 9, kind: output, shape index: {}]  }
   0x1   :  { %15 = vsyncpa [#allocation6], 0 }
   0x2   :  { %16 = vsyncpa [#allocation4], 0  ;;  %s27_s11 = sshll.u32 %s3522_s3, 4  ;;  %s2157_s12 = smov [#allocation2]   ;;  %s28_s11 = int_to_ptr.hbm [resolvable:$true] %s27_s11 }
   0x3   :  { %s29_s13 = sshll.u32 %s2157_s12, 4  ;;  %s42_s16 = sshll.u32 %s3524_s5, 4  ;;  %s30_s13 = int_to_ptr.vmem [resolvable:$true] %s29_s13  ;;  %s43_s16 = int_to_ptr.hbm [resolvable:$true] %s42_s16 }
   0x4   :  { %s2158_s17 = smov 256   ;;  %s2159_s18 = smov 16  }
   0x5   :  { %35 = dma.hbm_to_vmem [thread:$0]  %s28_s11, 4096, %s30_s13, [#allocation3], %s2158_s17, %s2158_s17, %s2159_s18  }
   0x6   :  { %s2160_s19 = smov [#allocation5]   ;;  %s2161_s21 = smov 128  }
   0x7   :  { %s44_s20 = sshll.u32 %s2160_s19, 4  ;;  %s2162_s22 = smov 8   ;;  %s45_s20 = int_to_ptr.vmem [resolvable:$true] %s44_s20 }
   0x8   :  { %50 = dma.hbm_to_vmem [thread:$0]  %s43_s16, 4096, %s45_s20, [#allocation6], %s2161_s21, %s2161_s21, %s2162_s22  }
   0x9   :  { %2151 = dma.done.wait [#allocation3], 4096  }
   0xa   :  { %2152 = vsyncadd [#allocation3], 4294963200 }
   0xb   :  { %2153 = dma.done.wait [#allocation6], 4096  }
   0xc   :  { %2154 = vsyncadd [#allocation6], 4294963200  ;;  %vm76_vm0 = vcmask 1040384   ;;  %vm72_vm1 = vcmask 72704   ;;  %v67_v0 = vld [vmem:[%s3520_s1 + $0x8] sm:$0x1] }
   0xd   :  { %v66_v1 = vld [vmem:[%s3520_s1] sm:$0xff]  ;;  %v78_v3 = vsel %vm76_vm0, %v67_v0, 0  ;;  %v270_v6 = vld [vmem:[#allocation2 + $0xf0] sm:$0xff]  ;;  %s2163_s13 = smov [#allocation7]   ;;  %s2050_s17 = sshll.u32 %s3528_s9, 4  ;;  %s2051_s17 = int_to_ptr.hbm [resolvable:$true] %s2050_s17 }
   0xe   :  { %v65_v2 = vld [vmem:[%s3519_s0] sm:$0xff]  ;;  %v2229_v4 = vand.u32 4294901760, %v66_v1  ;;  %v266_v8 = vld [vmem:[#allocation2 + $0xd0] sm:$0xff]  ;;  %v2232_v9 = vand.u32 4294901760, %v78_v3  ;;  %v2236_v11 = vand.u32 4294901760, %v270_v6  ;;  %s2048_s14 = sshll.u32 %s2163_s13, 4  ;;  %s2049_s14 = int_to_ptr.vmem [resolvable:$true] %s2048_s14 }
   0xf   :  { %v74_v5 = vsel %vm72_vm1, %v65_v2, 0  ;;  %v268_v7 = vld [vmem:[#allocation2 + $0xe0] sm:$0xff]  ;;  %v262_v14 = vld [vmem:[#allocation2 + $0xb0] sm:$0xff]  ;;  %v2241_v16 = vand.u32 4294901760, %v266_v8 }
  0x10   :  { %v2234_v10 = vand.u32 4294901760, %v74_v5  ;;  %v2238_v12 = vand.u32 4294901760, %v268_v7  ;;  %v264_v13 = vld [vmem:[#allocation2 + $0xc0] sm:$0xff]  ;;  %v128_v15 = vsub.f32 %v66_v1, %v2229_v4  ;;  %v2245_v18 = vand.u32 4294901760, %v262_v14  ;;  %95 = vmatpush.msra.mxu0 %v2232_v9  ;;  %279 = vmatpush.msra.mxu2 %v2236_v11  ;;  %v258_v41 = vld [vmem:[#allocation2 + $0x90] sm:$0xff] }
  0x11   :  { %v2243_v17 = vand.u32 4294901760, %v264_v13  ;;  %v122_v20 = vsub.f32 %v78_v3, %v2232_v9  ;;  %v2253_v21 = vsub.f32 %v270_v6, %v2236_v11  ;;  %v2259_v24 = vsub.f32 %v266_v8, %v2241_v16  ;;  %v260_v38 = vld [vmem:[#allocation2 + $0xa0] sm:$0xff]  ;;  %v254_v43 = vld [vmem:[#allocation2 + $0x70] sm:$0xff] }
  0x12   :  { %v2249_v19 = vsub.f32 %v74_v5, %v2234_v10  ;;  %v2256_v22 = vsub.f32 %v268_v7, %v2238_v12  ;;  %v129_v23 = vand.u32 4294901760, %v128_v15  ;;  %v2266_v26 = vsub.f32 %v262_v14, %v2245_v18  ;;  %97 = vmatpush.msra.mxu0 %v2229_v4  ;;  %281 = vmatpush.msra.mxu2 %v2238_v12  ;;  %v256_v42 = vld [vmem:[#allocation2 + $0x80] sm:$0xff]  ;;  %v250_v57 = vld [vmem:[#allocation2 + $0x50] sm:$0xff] }
  0x13   :  { %v2262_v25 = vsub.f32 %v264_v13, %v2243_v17  ;;  %v123_v28 = vand.u32 4294901760, %v122_v20  ;;  %v321_v29 = vand.u32 4294901760, %v2253_v21  ;;  %v333_v32 = vand.u32 4294901760, %v2259_v24  ;;  %v252_v50 = vld [vmem:[#allocation2 + $0x60] sm:$0xff]  ;;  %v246_v7 = vld [vmem:[#allocation2 + $0x30] sm:$0xff] }
  0x14   :  { %v100_v27 = vand.u32 4294901760, %v2249_v19  ;;  %v327_v30 = vand.u32 4294901760, %v2256_v22  ;;  %154 = vmatpush.msrb.mxu0 %v122_v20  ;;  %v130_v31 = vsub.f32 %v128_v15, %v129_v23  ;;  %v345_v40 = vand.u32 4294901760, %v2266_v26  ;;  %283 = vmatpush.msra.mxu2 %v2241_v16  ;;  %v248_v63 = vld [vmem:[#allocation2 + $0x40] sm:$0xff] }
  0x15   :  { %v339_v33 = vand.u32 4294901760, %v2262_v25  ;;  %v124_v35 = vsub.f32 %v122_v20, %v123_v28  ;;  %v322_v36 = vsub.f32 %v2253_v21, %v321_v29  ;;  %v334_v47 = vsub.f32 %v2259_v24, %v333_v32  ;;  %v244_v20 = vld [vmem:[#allocation2 + $0x20] sm:$0xff] }
  0x16   :  { %v101_v34 = vsub.f32 %v2249_v19, %v100_v27  ;;  %v328_v37 = vsub.f32 %v2256_v22, %v327_v30  ;;  %v131_v39 = vand.u32 4294901760, %v130_v31  ;;  %157 = vmatpush.msrb.mxu0 %v128_v15  ;;  %v2292_v49 = vand.u32 4294901760, %v260_v38  ;;  %285 = vmatpush.msra.mxu2 %v2243_v17 }
  0x17   :  { %v125_v45 = vand.u32 4294901760, %v124_v35  ;;  %v323_v46 = vand.u32 4294901760, %v322_v36  ;;  %v340_v48 = vsub.f32 %v2262_v25, %v339_v33  ;;  %v2295_v52 = vand.u32 4294901760, %v258_v41  ;;  %v242_v35 = vld [vmem:[#allocation2 + $0x10] sm:$0xff] }
  0x18   :  { %v102_v44 = vand.u32 4294901760, %v101_v34  ;;  %v329_v51 = vand.u32 4294901760, %v328_v37  ;;  %v2297_v53 = vand.u32 4294901760, %v256_v42  ;;  %v2299_v54 = vand.u32 4294901760, %v254_v43  ;;  %287 = vmatpush.msra.mxu2 %v2245_v18 }
  0x19   :  { %126 = vmatpush.msra.mxu1 %v125_v45  ;;  %324 = vmatpush.msra.mxu3 %v323_v46  ;;  %v346_v55 = vsub.f32 %v2266_v26, %v345_v40  ;;  %v2305_v56 = vsub.f32 %v260_v38, %v2292_v49  ;;  %v335_v58 = vand.u32 4294901760, %v334_v47  ;;  %v2308_v59 = vsub.f32 %v258_v41, %v2295_v52 }
  0x1a   :  { %103 = vmatmul.f32.vlgmr.msra.gmra.mxu0 %v102_v44  ;;  %v2311_v60 = vsub.f32 %v256_v42, %v2297_v53  ;;  %v2314_v61 = vand.u32 4294901760, %v252_v50  ;;  %v341_v0 = vand.u32 4294901760, %v340_v48  ;;  %v2321_v2 = vsub.f32 %v254_v43, %v2299_v54  ;;  %289 = vmatpush.msra.mxu2 %v2292_v49 }
  0x1b   :  { %206 = vmatpush.msra.mxu0 %v123_v28  ;;  %132 = vmatpush.msra.mxu1 %v131_v39  ;;  %v351_v62 = vand.u32 4294901760, %v2305_v56  ;;  %v357_v1 = vand.u32 4294901760, %v2308_v59  ;;  %v2323_v3 = vand.u32 4294901760, %v250_v57  ;;  %v347_v8 = vand.u32 4294901760, %v346_v55 }
  0x1c   :  { %134 = vmatmul.f32.vlgmr.msra.gmra.mxu1 %v2234_v10  ;;  %330 = vmatpush.msra.mxu3 %v329_v51  ;;  %v363_v6 = vand.u32 4294901760, %v2311_v60  ;;  %v2335_v14 = vsub.f32 %v252_v50, %v2314_v61  ;;  %v2337_v15 = vand.u32 4294901760, %v248_v63  ;;  %v369_v28 = vand.u32 4294901760, %v2321_v2 }
  0x1d   :  { %210 = vmatpush.msra.mxu0 %v129_v23  ;;  %179 = vmatpush.msrb.mxu1 %v2232_v9  ;;  %v352_v5 = vsub.f32 %v2305_v56, %v351_v62  ;;  %v358_v13 = vsub.f32 %v2308_v59, %v357_v1  ;;  %v2344_v31 = vsub.f32 %v250_v57, %v2323_v3  ;;  %v2346_v34 = vand.u32 4294901760, %v246_v7 }
  0x1e   :  { %336 = vmatpush.msra.mxu3 %v335_v58  ;;  %291 = vmatpush.msra.mxu2 %v2295_v52  ;;  %v375_v37 = vand.u32 4294901760, %v2335_v14  ;;  %v2356_v38 = vsub.f32 %v248_v63, %v2337_v15  ;;  %v2358_v39 = vand.u32 4294901760, %v244_v20  ;;  %v370_v41 = vsub.f32 %v2321_v2, %v369_v28 }
  0x1f   :  { %181 = vmatpush.msrb.mxu1 %v2229_v4  ;;  %v353_v23 = vand.u32 4294901760, %v352_v5  ;;  %v359_v36 = vand.u32 4294901760, %v358_v13  ;;  %v381_v42 = vand.u32 4294901760, %v2344_v31  ;;  %v2369_v43 = vsub.f32 %v246_v7, %v2346_v34 }
  0x20   :  { %342 = vmatpush.msra.mxu3 %v341_v0  ;;  %293 = vmatpush.msra.mxu2 %v2297_v53  ;;  %v2371_v44 = vand.u32 4294901760, %v242_v35  ;;  %v387_v45 = vand.u32 4294901760, %v2356_v38  ;;  %v2381_v46 = vsub.f32 %v244_v20, %v2358_v39  ;;  %v371_v48 = vand.u32 4294901760, %v370_v41 }
  0x21   :  { %231 = vmatpush.msra.mxu1 %v2232_v9  ;;  %v364_v9 = vsub.f32 %v2311_v60, %v363_v6  ;;  %v382_v50 = vsub.f32 %v2344_v31, %v381_v42  ;;  %v393_v51 = vand.u32 4294901760, %v2369_v43 }
  0x22   :  { %160 = vmatmul.f32.vlgmr.msrb.gmra.mxu0 %v2249_v19  ;;  %348 = vmatpush.msra.mxu3 %v347_v8  ;;  %v2394_v55 = vsub.f32 %v242_v35, %v2371_v44  ;;  %v388_v58 = vsub.f32 %v2356_v38, %v387_v45  ;;  %v399_v63 = vand.u32 4294901760, %v2381_v46 }
  0x23   :  { %233 = vmatpush.msra.mxu1 %v2229_v4  ;;  %422 = vmatpush.msrb.mxu0 %v2253_v21  ;;  %v240_v4 = vld [vmem:[#allocation2] sm:$0xff]  ;;  %v365_v19 = vand.u32 4294901760, %v364_v9  ;;  %v383_v5 = vand.u32 4294901760, %v382_v50  ;;  %v394_v7 = vsub.f32 %v2369_v43, %v393_v51  ;;  %v267_v21 = vld [vmem:[#allocation2 + $0xd8] sm:$0xff] }
  0x24   :  { %185 = vmatmul.f32.vlgmr.msrb.gmra.mxu1 %v100_v27  ;;  %354 = vmatpush.msra.mxu3 %v353_v23  ;;  %v376_v27 = vsub.f32 %v2335_v14, %v375_v37  ;;  %v2383_v47 = vand.u32 4294901760, %v240_v4  ;;  %v405_v8 = vand.u32 4294901760, %v2394_v55  ;;  %v400_v13 = vsub.f32 %v2381_v46, %v399_v63 }
  0x25   :  { %425 = vmatpush.msrb.mxu0 %v2256_v22  ;;  %475 = vmatpush.msrb.mxu1 %v2236_v11  ;;  %v395_v23 = vand.u32 4294901760, %v394_v7 }
  0x26   :  { %295 = vmatpush.msra.mxu2 %v2299_v54  ;;  %360 = vmatpush.msra.mxu3 %v359_v36  ;;  %v377_v57 = vand.u32 4294901760, %v376_v27  ;;  %v2404_v0 = vsub.f32 %v240_v4, %v2383_v47  ;;  %v406_v9 = vsub.f32 %v2394_v55, %v405_v8  ;;  %v401_v35 = vand.u32 4294901760, %v400_v13  ;;  %v249_v13 = vld [vmem:[#allocation2 + $0x48] sm:$0xff] }
  0x27   :  { %428 = vmatpush.msrb.mxu0 %v2259_v24  ;;  %477 = vmatpush.msrb.mxu1 %v2238_v12  ;;  %v2507_v24 = vand.u32 4294901760, %v267_v21 }
  0x28   :  { %297 = vmatpush.msra.mxu2 %v2314_v61  ;;  %366 = vmatpush.msra.mxu3 %v365_v19  ;;  %v411_v20 = vand.u32 4294901760, %v2404_v0  ;;  %v407_v4 = vand.u32 4294901760, %v406_v9  ;;  %v2597_v9 = vand.u32 4294901760, %v249_v13 }
  0x29   :  { %431 = vmatpush.msrb.mxu0 %v2262_v25  ;;  %479 = vmatpush.msrb.mxu1 %v2241_v16 }
  0x2a   :  { %212 = vmatmul.f32.vlgmr.msra.gmra.mxu0 %v2234_v10  ;;  %299 = vmatpush.msra.mxu2 %v2323_v3  ;;  %v412_v36 = vsub.f32 %v2404_v0, %v411_v20 }
  0x2b   :  { %434 = vmatpush.msrb.mxu0 %v2266_v26  ;;  %481 = vmatpush.msrb.mxu1 %v2243_v17  ;;  %v265_v26 = vld [vmem:[#allocation2 + $0xc8] sm:$0xff] }
  0x2c   :  { %235 = vmatmul.f32.vlgmr.msra.gmra.mxu1 %v2234_v10  ;;  %372 = vmatpush.msra.mxu3 %v371_v48  ;;  %v389_v10 = vand.u32 4294901760, %v388_v58  ;;  %v413_v41 = vand.u32 4294901760, %v412_v36  ;;  %v253_v48 = vld [vmem:[#allocation2 + $0x68] sm:$0xff] }
  0x2d   :  { %437 = vmatpush.msrb.mxu0 %v2305_v56  ;;  %483 = vmatpush.msrb.mxu1 %v2245_v18 }
  0x2e   :  { %301 = vmatpush.msra.mxu2 %v2337_v15  ;;  %378 = vmatpush.msra.mxu3 %v377_v57 }
  0x2f   :  { %440 = vmatpush.msrb.mxu0 %v2308_v59  ;;  %485 = vmatpush.msrb.mxu1 %v2292_v49  ;;  %v261_v59 = vld [vmem:[#allocation2 + $0xa8] sm:$0xff] }
  0x30   :  { %303 = vmatpush.msra.mxu2 %v2346_v34  ;;  %384 = vmatpush.msra.mxu3 %v383_v5 }
  0x31   :  { %443 = vmatpush.msrb.mxu0 %v2311_v60  ;;  %487 = vmatpush.msrb.mxu1 %v2295_v52 }
  0x32   :  { %305 = vmatpush.msra.mxu2 %v2358_v39  ;;  %390 = vmatpush.msra.mxu3 %v389_v10 }
  0x33   :  { %446 = vmatpush.msrb.mxu0 %v2321_v2  ;;  %489 = vmatpush.msrb.mxu1 %v2297_v53 }
  0x34   :  { %307 = vmatpush.msra.mxu2 %v2371_v44  ;;  %396 = vmatpush.msra.mxu3 %v395_v23 }
  0x35   :  { %449 = vmatpush.msrb.mxu0 %v2335_v14  ;;  %491 = vmatpush.msrb.mxu1 %v2299_v54 }
  0x36   :  { %309 = vmatpush.msra.mxu2 %v2383_v47  ;;  %402 = vmatpush.msra.mxu3 %v401_v35 }
  0x37   :  { %452 = vmatpush.msrb.mxu0 %v2344_v31  ;;  %493 = vmatpush.msrb.mxu1 %v2314_v61 }
  0x38   :  { %516 = vmatpush.msrb.mxu2 %v321_v29  ;;  %408 = vmatpush.msra.mxu3 %v407_v4  ;;  %v247_v4 = vld [vmem:[#allocation2 + $0x38] sm:$0xff] }
  0x39   :  { %455 = vmatpush.msrb.mxu0 %v2356_v38  ;;  %495 = vmatpush.msrb.mxu1 %v2323_v3 }
  0x3a   :  { %520 = vmatpush.msrb.mxu2 %v327_v30  ;;  %414 = vmatpush.msra.mxu3 %v413_v41 }
  0x3b   :  { %458 = vmatpush.msrb.mxu0 %v2369_v43  ;;  %497 = vmatpush.msrb.mxu1 %v2337_v15 }
  0x3c   :  { %583 = vmatpush.msrb.mxu3 %v2236_v11  ;;  %524 = vmatpush.msrb.mxu2 %v333_v32  ;;  %v271_v11 = vld [vmem:[#allocation2 + $0xf8] sm:$0xff]  ;;  %v2517_v32 = vand.u32 4294901760, %v265_v26 }
  0x3d   :  { %461 = vmatpush.msrb.mxu0 %v2381_v46  ;;  %499 = vmatpush.msrb.mxu1 %v2346_v34 }
  0x3e   :  { %585 = vmatpush.msrb.mxu3 %v2238_v12  ;;  %528 = vmatpush.msrb.mxu2 %v339_v33  ;;  %v2497_v12 = vand.u32 4294901760, %v271_v11  ;;  %v2520_v33 = vsub.f32 %v267_v21, %v2507_v24  ;;  %v2530_v56 = vsub.f32 %v265_v26, %v2517_v32  ;;  %v2607_v21 = vand.u32 4294901760, %v247_v4 }
  0x3f   :  { %464 = vmatpush.msrb.mxu0 %v2394_v55  ;;  %501 = vmatpush.msrb.mxu1 %v2358_v39  ;;  %v2576_v55 = vand.u32 4294901760, %v253_v48  ;;  %v2610_v26 = vsub.f32 %v249_v13, %v2597_v9 }
  0x40   :  { %587 = vmatpush.msrb.mxu3 %v2241_v16  ;;  %532 = vmatpush.msrb.mxu2 %v345_v40  ;;  %v269_v16 = vld [vmem:[#allocation2 + $0xe8] sm:$0xff]  ;;  %v263_v40 = vld [vmem:[#allocation2 + $0xb8] sm:$0xff]  ;;  %v680_v2 = vand.u32 4294901760, %v2530_v56 }
  0x41   :  { %467 = vmatpush.msrb.mxu0 %v2404_v0  ;;  %503 = vmatpush.msrb.mxu1 %v2371_v44 }
  0x42   :  { %589 = vmatpush.msrb.mxu3 %v2243_v17  ;;  %536 = vmatpush.msrb.mxu2 %v351_v62  ;;  %v2501_v17 = vsub.f32 %v271_v11, %v2497_v12  ;;  %v2536_v62 = vand.u32 4294901760, %v261_v59  ;;  %v681_v31 = vsub.f32 %v2530_v56, %v680_v2 }
  0x43   :  { %505 = vmatpush.msrb.mxu1 %v2383_v47  ;;  %620 = vmatpush.msra.mxu0 %v2497_v12 }
  0x44   :  { %591 = vmatpush.msrb.mxu3 %v2245_v18  ;;  %540 = vmatpush.msrb.mxu2 %v357_v1  ;;  %v2503_v18 = vand.u32 4294901760, %v269_v16  ;;  %v662_v22 = vand.u32 4294901760, %v2501_v17  ;;  %v682_v43 = vand.u32 4294901760, %v681_v31 }
  0x46   :  { %593 = vmatpush.msrb.mxu3 %v2292_v49  ;;  %544 = vmatpush.msrb.mxu2 %v363_v6  ;;  %v2510_v25 = vsub.f32 %v269_v16, %v2503_v18  ;;  %v663_v29 = vsub.f32 %v2501_v17, %v662_v22 }
  0x47   :  { %622 = vmatpush.msra.mxu0 %v2503_v18 }
  0x48   :  { %595 = vmatpush.msrb.mxu3 %v2295_v52  ;;  %548 = vmatpush.msrb.mxu2 %v369_v28  ;;  %v668_v30 = vand.u32 4294901760, %v2510_v25  ;;  %v664_v49 = vand.u32 4294901760, %v663_v29  ;;  %v2547_v28 = vsub.f32 %v261_v59, %v2536_v62  ;;  %v245_v29 = vld [vmem:[#allocation2 + $0x28] sm:$0xff]  ;;  %v2619_v59 = vsub.f32 %v247_v4, %v2607_v21 }
  0x49   :  { %624 = vmatpush.msra.mxu0 %v2507_v24 }
  0x4a   :  { %597 = vmatpush.msrb.mxu3 %v2297_v53  ;;  %552 = vmatpush.msrb.mxu2 %v375_v37  ;;  %v669_v52 = vsub.f32 %v2510_v25, %v668_v30  ;;  %v674_v53 = vand.u32 4294901760, %v2520_v33  ;;  %v692_v38 = vand.u32 4294901760, %v2547_v28 }
  0x4b   :  { %626 = vmatpush.msra.mxu0 %v2517_v32  ;;  %665 = vmatpush.msra.mxu1 %v664_v49 }
  0x4c   :  { %599 = vmatpush.msrb.mxu3 %v2299_v54  ;;  %556 = vmatpush.msrb.mxu2 %v381_v42  ;;  %v2527_v54 = vand.u32 4294901760, %v263_v40  ;;  %v670_v60 = vand.u32 4294901760, %v669_v52  ;;  %v693_v27 = vsub.f32 %v2547_v28, %v692_v38  ;;  %v2616_v52 = vand.u32 4294901760, %v245_v29 }
  0x4e   :  { %601 = vmatpush.msrb.mxu3 %v2314_v61  ;;  %560 = vmatpush.msrb.mxu2 %v387_v45  ;;  %v675_v61 = vsub.f32 %v2520_v33, %v674_v53  ;;  %v2539_v1 = vsub.f32 %v263_v40, %v2527_v54  ;;  %v694_v50 = vand.u32 4294901760, %v693_v27 }
  0x4f   :  { %628 = vmatpush.msra.mxu0 %v2527_v54  ;;  %671 = vmatpush.msra.mxu1 %v670_v60  ;;  %v728_v60 = vand.u32 4294901760, %v2610_v26 }
  0x50   :  { %603 = vmatpush.msrb.mxu3 %v2323_v3  ;;  %564 = vmatpush.msrb.mxu2 %v393_v51  ;;  %v259_v3 = vld [vmem:[#allocation2 + $0x98] sm:$0xff]  ;;  %v676_v6 = vand.u32 4294901760, %v675_v61  ;;  %v686_v14 = vand.u32 4294901760, %v2539_v1 }
  0x51   :  { %630 = vmatpush.msra.mxu0 %v2536_v62  ;;  %v243_v61 = vld [vmem:[#allocation2 + $0x18] sm:$0xff] }
  0x52   :  { %605 = vmatpush.msrb.mxu3 %v2337_v15  ;;  %568 = vmatpush.msrb.mxu2 %v399_v63  ;;  %v2544_v15 = vand.u32 4294901760, %v259_v3  ;;  %v687_v37 = vsub.f32 %v2539_v1, %v686_v14  ;;  %v251_v63 = vld [vmem:[#allocation2 + $0x58] sm:$0xff]  ;;  %v2624_v31 = vand.u32 4294901760, %v243_v61 }
  0x53   :  { %677 = vmatpush.msra.mxu1 %v676_v6  ;;  %v2584_v7 = vand.u32 4294901760, %v251_v63  ;;  %v734_v6 = vand.u32 4294901760, %v2619_v59 }
  0x54   :  { %607 = vmatpush.msrb.mxu3 %v2346_v34  ;;  %572 = vmatpush.msrb.mxu2 %v405_v8  ;;  %v257_v34 = vld [vmem:[#allocation2 + $0x88] sm:$0xff]  ;;  %v2560_v42 = vsub.f32 %v259_v3, %v2544_v15  ;;  %v688_v19 = vand.u32 4294901760, %v687_v37  ;;  %v2587_v8 = vsub.f32 %v253_v48, %v2576_v55  ;;  %v729_v37 = vsub.f32 %v2610_v26, %v728_v60 }
  0x55   :  { %632 = vmatpush.msra.mxu0 %v2544_v15  ;;  %683 = vmatpush.msra.mxu1 %v682_v43  ;;  %v2600_v35 = vsub.f32 %v251_v63, %v2584_v7  ;;  %v735_v43 = vsub.f32 %v2619_v59, %v734_v6 }
  0x56   :  { %609 = vmatpush.msrb.mxu3 %v2358_v39  ;;  %576 = vmatpush.msrb.mxu2 %v411_v20  ;;  %v2557_v39 = vand.u32 4294901760, %v257_v34  ;;  %v698_v45 = vand.u32 4294901760, %v2560_v42  ;;  %v716_v23 = vand.u32 4294901760, %v2587_v8  ;;  %v730_v27 = vand.u32 4294901760, %v729_v37 }
  0x57   :  { %689 = vmatpush.msra.mxu1 %v688_v19  ;;  %v722_v16 = vand.u32 4294901760, %v2600_v35  ;;  %v241_v19 = vld [vmem:[#allocation2 + $0x8] sm:$0xff] }
  0x58   :  { %611 = vmatpush.msrb.mxu3 %v2371_v44  ;;  %v255_v44 = vld [vmem:[#allocation2 + $0x78] sm:$0xff]  ;;  %634 = vmatpush.msra.mxu0 %v2557_v39  ;;  %v699_v51 = vsub.f32 %v2560_v42, %v698_v45  ;;  %v717_v11 = vsub.f32 %v2587_v8, %v716_v23  ;;  %v2637_v48 = vand.u32 4294901760, %v241_v19 }
  0x59   :  { %v2567_v46 = vand.u32 4294901760, %v255_v44  ;;  %695 = vmatpush.msra.mxu1 %v694_v50  ;;  %v723_v49 = vsub.f32 %v2600_v35, %v722_v16  ;;  %v2640_v50 = vsub.f32 %v243_v61, %v2624_v31 }
  0x5a   :  { %613 = vmatpush.msrb.mxu3 %v2383_v47  ;;  %v2570_v47 = vsub.f32 %v257_v34, %v2557_v39  ;;  %v700_v0 = vand.u32 4294901760, %v699_v51  ;;  %v718_v40 = vand.u32 4294901760, %v717_v11  ;;  %v2627_v34 = vsub.f32 %v245_v29, %v2616_v52  ;;  %v2068_v29 = vld [vmem:[%s3521_s2] ss:$0 sm:$0xff] }
  0x5b   :  { %636 = vmatpush.msra.mxu0 %v2567_v46  ;;  %v2579_v57 = vsub.f32 %v255_v44, %v2567_v46  ;;  %v724_v3 = vand.u32 4294901760, %v723_v49  ;;  %v736_v51 = vand.u32 4294901760, %v735_v43 }
  0x5c   :  { %v704_v58 = vand.u32 4294901760, %v2570_v47  ;;  %701 = vmatpush.msra.mxu1 %v700_v0  ;;  %v740_v44 = vand.u32 4294901760, %v2627_v34  ;;  %v3530_v0 = vand.u32 4294901760, %v2640_v50 }
  0x5d   :  { %638 = vmatpush.msra.mxu0 %v2576_v55  ;;  %v710_v5 = vand.u32 4294901760, %v2579_v57 }
  0x5e   :  { %v705_v10 = vsub.f32 %v2570_v47, %v704_v58  ;;  %v741_v63 = vsub.f32 %v2627_v34, %v740_v44 }
  0x5f   :  { %v711_v20 = vsub.f32 %v2579_v57, %v710_v5  ;;  %640 = vmatpush.msra.mxu0 %v2584_v7 }
  0x60   :  { %v706_v36 = vand.u32 4294901760, %v705_v10  ;;  %v2648_v10 = vsub.f32 %v241_v19, %v2637_v48  ;;  %v742_v13 = vand.u32 4294901760, %v741_v63 }
  0x61   :  { %v712_v41 = vand.u32 4294901760, %v711_v20  ;;  %642 = vmatpush.msra.mxu0 %v2597_v9  ;;  %v747_v20 = vsub.f32 %v2640_v50, %v3530_v0 }
  0x62   :  { %707 = vmatpush.msra.mxu1 %v706_v36  ;;  %v3529_v36 = vand.u32 4294901760, %v2648_v10 }
  0x63   :  { %644 = vmatpush.msra.mxu0 %v2607_v21  ;;  %v748_v4 = vand.u32 4294901760, %v747_v20 }
  0x64   :  { %713 = vmatpush.msra.mxu1 %v712_v41  ;;  %v753_v41 = vsub.f32 %v2648_v10, %v3529_v36 }
  0x65   :  { %646 = vmatpush.msra.mxu0 %v2616_v52 }
  0x66   :  { %719 = vmatpush.msra.mxu1 %v718_v40  ;;  %v754_v40 = vand.u32 4294901760, %v753_v41 }
  0x67   :  { %648 = vmatpush.msra.mxu0 %v2624_v31 }
  0x68   :  { %725 = vmatpush.msra.mxu1 %v724_v3 }
  0x69   :  { %650 = vmatpush.msra.mxu0 %v2637_v48 }
  0x6a   :  { %731 = vmatpush.msra.mxu1 %v730_v27 }
  0x6c   :  { %737 = vmatpush.msra.mxu1 %v736_v51 }
  0x6e   :  { %743 = vmatpush.msra.mxu1 %v742_v13 }
  0x70   :  { %749 = vmatpush.msra.mxu1 %v748_v4 }
  0x72   :  { %755 = vmatpush.msra.mxu1 %v754_v40 }
  0x97   :  { %v104_v11 = vpop.f32.mrf.mxu0 }
  0x98   :  { %v105_v61 = vadd.f32 %v2068_v29, %v104_v11 }
  0x99   :  { %v135_v49 = vpop.f32.mrf.mxu1 }
  0x9a   :  { %v136_v37 = vadd.f32 %v135_v49, %v105_v61  ;;  %v966_v61 = vld [vmem:[#allocation5 + $0x20] sm:$0xff] }
  0x9f   :  { %v161_v3 = vpop.f32.mrf.mxu0 }
  0xa0   :  { %v162_v43 = vadd.f32 %v161_v3, %v136_v37 }
  0xa1   :  { %v186_v19 = vpop.f32.mrf.mxu1 }
  0xa2   :  { %v187_v27 = vadd.f32 %v186_v19, %v162_v43  ;;  %v965_v19 = vld [vmem:[#allocation5 + $0x18] sm:$0xff] }
  0xa7   :  { %v213_v51 = vpop.f32.mrf.mxu0 }
  0xa8   :  { %v214_v63 = vadd.f32 %v213_v51, %v187_v27 }
  0xa9   :  { %v236_v13 = vpop.f32.mrf.mxu1 }
  0xaa   :  { %v237_v20 = vadd.f32 %v236_v13, %v214_v63  ;;  %v2837_v63 = vand.u32 4294901760, %v966_v61 }
  0xac   :  { %2071 = vtanh.f32 %v237_v20 }
  0xb2   :  { %v2072_v36 = vpop.eup %2071 }
  0xb3   :  { %v2660_v0 = vand.u32 4294901760, %v2072_v36 }
  0xb5   :  { %416 = vmatmul.f32.vlgmr.msra.gmra.mxu3 %v2660_v0  ;;  %v2664_v4 = vsub.f32 %v2072_v36, %v2660_v0 }
  0xb6   :  { %816 = vmatpush.msra.mxu3 %v2497_v12 }
  0xb7   :  { %470 = vmatmul.f32.vlgmr.msrb.gmra.mxu0 %v2664_v4  ;;  %v2669_v41 = vand.u32 4294901760, %v2664_v4 }
  0xb8   :  { %818 = vmatpush.msra.mxu3 %v2503_v18  ;;  %857 = vmatpush.msrb.mxu0 %v662_v22  ;;  %v975_v22 = vld [vmem:[#allocation5 + $0x68] sm:$0xff] }
  0xb9   :  { %509 = vmatmul.f32.vlgmr.msrb.gmra.mxu1 %v2669_v41  ;;  %v313_v11 = vsub.f32 %v2664_v4, %v2669_v41 }
  0xba   :  { %820 = vmatpush.msra.mxu3 %v2507_v24  ;;  %861 = vmatpush.msrb.mxu0 %v668_v30 }
  0xbb   :  { %924 = vmatpush.msrb.mxu1 %v2497_v12  ;;  %v314_v36 = vand.u32 4294901760, %v313_v11  ;;  %v977_v12 = vld [vmem:[#allocation5 + $0x78] sm:$0xff]  ;;  %v2849_v11 = vand.u32 4294901760, %v965_v19 }
  0xbc   :  { %822 = vmatpush.msra.mxu3 %v2517_v32  ;;  %865 = vmatpush.msrb.mxu0 %v674_v53 }
  0xbd   :  { %926 = vmatpush.msrb.mxu1 %v2503_v18  ;;  %315 = vmatmul.f32.vlgmr.msra.gmra.mxu2 %v314_v36  ;;  %v2708_v18 = vand.u32 4294901760, %v977_v12 }
  0xbe   :  { %615 = vmatmul.f32.vlgmr.msrb.gmra.mxu3 %v2660_v0  ;;  %763 = vmatpush.msra.mxu2 %v2501_v17  ;;  %v976_v17 = vld [vmem:[#allocation5 + $0x70] sm:$0xff] }
  0xbf   :  { %824 = vmatpush.msra.mxu3 %v2527_v54  ;;  %869 = vmatpush.msrb.mxu0 %v680_v2  ;;  %v2723_v30 = vsub.f32 %v977_v12, %v2708_v18  ;;  %v2859_v12 = vsub.f32 %v966_v61, %v2837_v63 }
  0xc0   :  { %928 = vmatpush.msrb.mxu1 %v2507_v24  ;;  %656 = vmatmul.f32.vlgmr.msra.gmra.mxu0 %v314_v36  ;;  %v2715_v24 = vand.u32 4294901760, %v976_v17 }
  0xc1   :  { %766 = vmatpush.msra.mxu2 %v2510_v25  ;;  %826 = vmatpush.msra.mxu3 %v2536_v62  ;;  %v974_v25 = vld [vmem:[#allocation5 + $0x60] sm:$0xff] }
  0xc2   :  { %873 = vmatpush.msrb.mxu0 %v686_v14  ;;  %930 = vmatpush.msrb.mxu1 %v2517_v32  ;;  %v2725_v32 = vand.u32 4294901760, %v975_v22  ;;  %v2733_v53 = vsub.f32 %v976_v17, %v2715_v24 }
  0xc3   :  { %757 = vmatmul.f32.vlgmr.msra.gmra.mxu1 %v2660_v0  ;;  %769 = vmatpush.msra.mxu2 %v2520_v33  ;;  %v973_v33 = vld [vmem:[#allocation5 + $0x58] sm:$0xff] }
  0xc4   :  { %828 = vmatpush.msra.mxu3 %v2544_v15  ;;  %877 = vmatpush.msrb.mxu0 %v692_v38  ;;  %v2746_v2 = vsub.f32 %v975_v22, %v2725_v32 }
  0xc5   :  { %932 = vmatpush.msrb.mxu1 %v2527_v54  ;;  %772 = vmatpush.msra.mxu2 %v2530_v56  ;;  %v2735_v54 = vand.u32 4294901760, %v974_v25  ;;  %v972_v56 = vld [vmem:[#allocation5 + $0x50] sm:$0xff] }
  0xc6   :  { %830 = vmatpush.msra.mxu3 %v2557_v39  ;;  %881 = vmatpush.msrb.mxu0 %v698_v45  ;;  %v2750_v14 = vand.u32 4294901760, %v972_v56 }
  0xc7   :  { %934 = vmatpush.msrb.mxu1 %v2536_v62  ;;  %578 = vmatmul.f32.vlgmr.msrb.gmra.mxu2 %v2660_v0  ;;  %v2739_v62 = vand.u32 4294901760, %v973_v33  ;;  %v2757_v38 = vsub.f32 %v974_v25, %v2735_v54 }
  0xc8   :  { %775 = vmatpush.msra.mxu2 %v2539_v1  ;;  %832 = vmatpush.msra.mxu3 %v2567_v46  ;;  %v1041_v1 = vand.u32 4294901760, %v2723_v30 }
  0xc9   :  { %885 = vmatpush.msrb.mxu0 %v704_v58  ;;  %936 = vmatpush.msrb.mxu1 %v2544_v15  ;;  %v971_v15 = vld [vmem:[#allocation5 + $0x48] sm:$0xff] }
  0xca   :  { %778 = vmatpush.msra.mxu2 %v2547_v28  ;;  %834 = vmatpush.msra.mxu3 %v2576_v55  ;;  %v1047_v28 = vand.u32 4294901760, %v2733_v53  ;;  %v1042_v45 = vsub.f32 %v2723_v30, %v1041_v1 }
  0xcb   :  { %889 = vmatpush.msrb.mxu0 %v710_v5  ;;  %938 = vmatpush.msrb.mxu1 %v2557_v39  ;;  %v2762_v39 = vsub.f32 %v973_v33, %v2739_v62  ;;  %v1059_v5 = vand.u32 4294901760, %v2757_v38 }
  0xcc   :  { %781 = vmatpush.msra.mxu2 %v2560_v42  ;;  %836 = vmatpush.msra.mxu3 %v2584_v7  ;;  %v970_v42 = vld [vmem:[#allocation5 + $0x40] sm:$0xff]  ;;  %v1048_v58 = vsub.f32 %v2733_v53, %v1047_v28 }
  0xcd   :  { %893 = vmatpush.msrb.mxu0 %v716_v23  ;;  %940 = vmatpush.msrb.mxu1 %v2567_v46  ;;  %v1053_v46 = vand.u32 4294901760, %v2746_v2  ;;  %v968_v23 = vld [vmem:[#allocation5 + $0x30] sm:$0xff]  ;;  %v1060_v29 = vsub.f32 %v2757_v38, %v1059_v5 }
  0xce   :  { %784 = vmatpush.msra.mxu2 %v2570_v47  ;;  %838 = vmatpush.msra.mxu3 %v2597_v9  ;;  %v2771_v47 = vand.u32 4294901760, %v971_v15  ;;  %v2813_v49 = vand.u32 4294901760, %v968_v23 }
  0xcf   :  { %897 = vmatpush.msrb.mxu0 %v722_v16  ;;  %942 = vmatpush.msrb.mxu1 %v2576_v55  ;;  %v2776_v55 = vsub.f32 %v972_v56, %v2750_v14  ;;  %v1054_v16 = vsub.f32 %v2746_v2, %v1053_v46  ;;  %v2871_v56 = vsub.f32 %v965_v19, %v2849_v11 }
  0xd0   :  { %787 = vmatpush.msra.mxu2 %v2579_v57  ;;  %840 = vmatpush.msra.mxu3 %v2607_v21  ;;  %v969_v57 = vld [vmem:[#allocation5 + $0x38] sm:$0xff]  ;;  %v2835_v51 = vsub.f32 %v968_v23, %v2813_v49 }
  0xd1   :  { %901 = vmatpush.msrb.mxu0 %v728_v60  ;;  %944 = vmatpush.msrb.mxu1 %v2584_v7  ;;  %v2785_v7 = vand.u32 4294901760, %v970_v42  ;;  %v2799_v60 = vand.u32 4294901760, %v969_v57 }
  0xd2   :  { %790 = vmatpush.msra.mxu2 %v2587_v8  ;;  %842 = vmatpush.msra.mxu3 %v2616_v52  ;;  %v1065_v8 = vand.u32 4294901760, %v2762_v39  ;;  %v1095_v36 = vand.u32 4294901760, %v2835_v51 }
  0xd3   :  { %905 = vmatpush.msrb.mxu0 %v734_v6  ;;  %946 = vmatpush.msrb.mxu1 %v2597_v9  ;;  %v3534_v9 = vand.u32 4294901760, %v2640_v50  ;;  %v967_v6 = vld [vmem:[#allocation5 + $0x28] sm:$0xff]  ;;  %v2811_v40 = vsub.f32 %v970_v42, %v2785_v7  ;;  %v2823_v37 = vsub.f32 %v969_v57, %v2799_v60 }
  0xd4   :  { %793 = vmatpush.msra.mxu2 %v2600_v35  ;;  %844 = vmatpush.msra.mxu3 %v2624_v31  ;;  %v1043_v35 = vand.u32 4294901760, %v1042_v45  ;;  %v2825_v43 = vand.u32 4294901760, %v967_v6  ;;  %v1096_v42 = vsub.f32 %v2835_v51, %v1095_v36  ;;  %v1107_v45 = vand.u32 4294901760, %v2859_v12 }
  0xd5   :  { %909 = vmatpush.msrb.mxu0 %v740_v44  ;;  %948 = vmatpush.msrb.mxu1 %v2607_v21  ;;  %v2797_v21 = vsub.f32 %v971_v15, %v2771_v47  ;;  %v3535_v44 = vand.u32 4294901760, %v2648_v10  ;;  %v1083_v27 = vand.u32 4294901760, %v2811_v40  ;;  %v1089_v20 = vand.u32 4294901760, %v2823_v37 }
  0xd6   :  { %796 = vmatpush.msra.mxu2 %v2610_v26  ;;  %846 = vmatpush.msra.mxu3 %v2637_v48  ;;  %v1071_v26 = vand.u32 4294901760, %v2776_v55 }
  0xd7   :  { %913 = vmatpush.msrb.mxu0 %v3534_v9  ;;  %950 = vmatpush.msrb.mxu1 %v2616_v52  ;;  %v1049_v52 = vand.u32 4294901760, %v1048_v58  ;;  %v1077_v3 = vand.u32 4294901760, %v2797_v21  ;;  %v1090_v25 = vsub.f32 %v2823_v37, %v1089_v20  ;;  %v1113_v9 = vand.u32 4294901760, %v2871_v56 }
  0xd8   :  { %850 = vmatmul.f32.vlgmr.msra.gmra.mxu3 %v2669_v41  ;;  %799 = vmatpush.msra.mxu2 %v2619_v59  ;;  %v1066_v59 = vsub.f32 %v2762_v39, %v1065_v8  ;;  %v2847_v41 = vsub.f32 %v967_v6, %v2825_v43 }
  0xd9   :  { %917 = vmatpush.msrb.mxu0 %v3535_v44  ;;  %952 = vmatpush.msrb.mxu1 %v2624_v31  ;;  %v1055_v31 = vand.u32 4294901760, %v1054_v16  ;;  %v1078_v13 = vsub.f32 %v2797_v21, %v1077_v3  ;;  %v1091_v58 = vand.u32 4294901760, %v1090_v25  ;;  %v1108_v16 = vsub.f32 %v2859_v12, %v1107_v45  ;;  %v993_v25 = vld [vmem:[#allocation5 + $0xf8] sm:$0xff] }
  0xda   :  { %919 = vmatmul.f32.vlgmr.msrb.gmra.mxu0 %v2660_v0  ;;  %802 = vmatpush.msra.mxu2 %v2627_v34  ;;  %v1072_v34 = vsub.f32 %v2776_v55, %v1071_v26  ;;  %v1101_v33 = vand.u32 4294901760, %v2847_v41 }
  0xdb   :  { %954 = vmatpush.msrb.mxu1 %v2637_v48  ;;  %1044 = vmatpush.msrb.mxu3 %v1043_v35  ;;  %v1061_v48 = vand.u32 4294901760, %v1060_v29  ;;  %v1079_v22 = vand.u32 4294901760, %v1078_v13  ;;  %v1097_v35 = vand.u32 4294901760, %v1096_v42  ;;  %v1109_v29 = vand.u32 4294901760, %v1108_v16 }
  0xdc   :  { %956 = vmatmul.f32.vlgmr.msrb.gmra.mxu1 %v2660_v0  ;;  %805 = vmatpush.msra.mxu2 %v2640_v50  ;;  %v1067_v0 = vand.u32 4294901760, %v1066_v59  ;;  %v964_v50 = vld [vmem:[#allocation5 + $0x10] sm:$0xff]  ;;  %v1102_v23 = vsub.f32 %v2847_v41, %v1101_v33 }
  0xdd   :  { %1050 = vmatpush.msrb.mxu3 %v1049_v52  ;;  %1195 = vmatpush.msra.mxu1 %v2708_v18  ;;  %v2861_v17 = vand.u32 4294901760, %v964_v50  ;;  %v1114_v52 = vsub.f32 %v2871_v56, %v1113_v9 }
  0xde   :  { %808 = vmatpush.msra.mxu2 %v2648_v10  ;;  %1142 = vmatpush.msra.mxu0 %v2723_v30  ;;  %v1073_v10 = vand.u32 4294901760, %v1072_v34  ;;  %v1103_v44 = vand.u32 4294901760, %v1102_v23  ;;  %v963_v34 = vld [vmem:[#allocation5 + $0x8] sm:$0xff] }
  0xdf   :  { %811 = vmatmul.f32.vlgmr.msra.gmra.mxu2 %v2664_v4  ;;  %1056 = vmatpush.msrb.mxu3 %v1055_v31  ;;  %v1084_v4 = vsub.f32 %v2811_v40, %v1083_v27  ;;  %v2881_v57 = vsub.f32 %v964_v50, %v2861_v17  ;;  %v1115_v61 = vand.u32 4294901760, %v1114_v52  ;;  %v2928_v19 = vand.u32 4294901760, %v963_v34 }
  0xe0   :  { %1197 = vmatpush.msra.mxu1 %v2715_v24  ;;  %999 = vmatpush.msrb.mxu2 %v2708_v18 }
  0xe1   :  { %1062 = vmatpush.msrb.mxu3 %v1061_v48  ;;  %1145 = vmatpush.msra.mxu0 %v2733_v53  ;;  %v1085_v15 = vand.u32 4294901760, %v1084_v4  ;;  %v1119_v6 = vand.u32 4294901760, %v2881_v57  ;;  %v962_v48 = vld [vmem:[#allocation5] sm:$0xff] }
  0xe2   :  { %1199 = vmatpush.msra.mxu1 %v2725_v32  ;;  %1001 = vmatpush.msrb.mxu2 %v2715_v24  ;;  %v2933_v50 = vand.u32 4294901760, %v962_v48 }
  0xe3   :  { %1068 = vmatpush.msrb.mxu3 %v1067_v0  ;;  %1148 = vmatpush.msra.mxu0 %v2746_v2  ;;  %v1120_v59 = vsub.f32 %v2881_v57, %v1119_v6  ;;  %v2931_v0 = vsub.f32 %v963_v34, %v2928_v19  ;;  %v990_v2 = vld [vmem:[#allocation5 + $0xe0] sm:$0xff] }
  0xe4   :  { %1201 = vmatpush.msra.mxu1 %v2735_v54  ;;  %1003 = vmatpush.msrb.mxu2 %v2725_v32 }
  0xe5   :  { %1074 = vmatpush.msrb.mxu3 %v1073_v10  ;;  %1151 = vmatpush.msra.mxu0 %v2757_v38  ;;  %v1121_v31 = vand.u32 4294901760, %v1120_v59  ;;  %v1125_v13 = vand.u32 4294901760, %v2931_v0  ;;  %v2939_v10 = vsub.f32 %v962_v48, %v2933_v50  ;;  %v2983_v59 = vand.u32 4294901760, %v990_v2  ;;  %v989_v38 = vld [vmem:[#allocation5 + $0xd8] sm:$0xff] }
  0xe6   :  { %1203 = vmatpush.msra.mxu1 %v2739_v62  ;;  %1005 = vmatpush.msrb.mxu2 %v2735_v54 }
  0xe7   :  { %1080 = vmatpush.msrb.mxu3 %v1079_v22  ;;  %1154 = vmatpush.msra.mxu0 %v2762_v39  ;;  %v1126_v4 = vsub.f32 %v2931_v0, %v1125_v13  ;;  %v1131_v22 = vand.u32 4294901760, %v2939_v10  ;;  %v2998_v39 = vand.u32 4294901760, %v989_v38 }
  0xe8   :  { %1205 = vmatpush.msra.mxu1 %v2750_v14  ;;  %1007 = vmatpush.msrb.mxu2 %v2739_v62 }
  0xe9   :  { %1086 = vmatpush.msrb.mxu3 %v1085_v15  ;;  %1157 = vmatpush.msra.mxu0 %v2776_v55  ;;  %v2950_v15 = vand.u32 4294901760, %v993_v25  ;;  %v1127_v42 = vand.u32 4294901760, %v1126_v4  ;;  %v1132_v30 = vsub.f32 %v2939_v10, %v1131_v22  ;;  %v3009_v55 = vsub.f32 %v989_v38, %v2998_v39 }
  0xea   :  { %1207 = vmatpush.msra.mxu1 %v2771_v47  ;;  %1009 = vmatpush.msrb.mxu2 %v2750_v14 }
  0xeb   :  { %1092 = vmatpush.msrb.mxu3 %v1091_v58  ;;  %1160 = vmatpush.msra.mxu0 %v2797_v21  ;;  %v2959_v58 = vsub.f32 %v993_v25, %v2950_v15  ;;  %v1133_v53 = vand.u32 4294901760, %v1132_v30  ;;  %v1406_v30 = vand.u32 4294901760, %v3009_v55 }
  0xec   :  { %1209 = vmatpush.msra.mxu1 %v2785_v7  ;;  %1011 = vmatpush.msrb.mxu2 %v2771_v47 }
  0xed   :  { %1098 = vmatpush.msrb.mxu3 %v1097_v35  ;;  %1163 = vmatpush.msra.mxu0 %v2811_v40  ;;  %v1382_v35 = vand.u32 4294901760, %v2959_v58 }
  0xee   :  { %1211 = vmatpush.msra.mxu1 %v2799_v60  ;;  %1013 = vmatpush.msrb.mxu2 %v2785_v7 }
  0xef   :  { %1104 = vmatpush.msrb.mxu3 %v1103_v44  ;;  %1166 = vmatpush.msra.mxu0 %v2823_v37 }
  0xf0   :  { %1213 = vmatpush.msra.mxu1 %v2813_v49  ;;  %1015 = vmatpush.msrb.mxu2 %v2799_v60 }
  0xf1   :  { %1110 = vmatpush.msrb.mxu3 %v1109_v29  ;;  %1169 = vmatpush.msra.mxu0 %v2835_v51 }
  0xf2   :  { %1215 = vmatpush.msra.mxu1 %v2825_v43  ;;  %1017 = vmatpush.msrb.mxu2 %v2813_v49 }
  0xf3   :  { %1116 = vmatpush.msrb.mxu3 %v1115_v61  ;;  %1172 = vmatpush.msra.mxu0 %v2847_v41 }
  0xf4   :  { %1217 = vmatpush.msra.mxu1 %v2837_v63  ;;  %1019 = vmatpush.msrb.mxu2 %v2825_v43 }
  0xf5   :  { %1122 = vmatpush.msrb.mxu3 %v1121_v31  ;;  %1175 = vmatpush.msra.mxu0 %v2859_v12  ;;  %v2994_v31 = vsub.f32 %v990_v2, %v2983_v59 }
  0xf6   :  { %1219 = vmatpush.msra.mxu1 %v2849_v11  ;;  %1021 = vmatpush.msrb.mxu2 %v2837_v63 }
  0xf7   :  { %1178 = vmatpush.msra.mxu0 %v2871_v56  ;;  %1128 = vmatpush.msrb.mxu3 %v1127_v42  ;;  %v1400_v48 = vand.u32 4294901760, %v2994_v31 }
  0xf8   :  { %1221 = vmatpush.msra.mxu1 %v2861_v17  ;;  %1023 = vmatpush.msrb.mxu2 %v2849_v11 }
  0xf9   :  { %1181 = vmatpush.msra.mxu0 %v2881_v57  ;;  %1134 = vmatpush.msrb.mxu3 %v1133_v53  ;;  %v1401_v25 = vsub.f32 %v2994_v31, %v1400_v48  ;;  %v986_v53 = vld [vmem:[#allocation5 + $0xc0] sm:$0xff] }
  0xfa   :  { %1025 = vmatpush.msrb.mxu2 %v2861_v17  ;;  %1223 = vmatpush.msra.mxu1 %v2928_v19 }
  0xfb   :  { %1184 = vmatpush.msra.mxu0 %v2931_v0  ;;  %1303 = vmatpush.msra.mxu3 %v2708_v18 }
  0xfc   :  { %1027 = vmatpush.msrb.mxu2 %v2928_v19  ;;  %1225 = vmatpush.msra.mxu1 %v2933_v50 }
  0xfd   :  { %1187 = vmatpush.msra.mxu0 %v2939_v10  ;;  %1305 = vmatpush.msra.mxu3 %v2715_v24 }
  0xfe   :  { %1029 = vmatpush.msrb.mxu2 %v2933_v50 }
  0xff   :  { %1340 = vmatpush.msrb.mxu0 %v2950_v15  ;;  %1307 = vmatpush.msra.mxu3 %v2725_v32 }
 0x100   :  { %1236 = vmatpush.msra.mxu2 %v1041_v1  ;;  %v992_v1 = vld [vmem:[#allocation5 + $0xf0] sm:$0xff] }
 0x101   :  { %v2961_v23 = vand.u32 4294901760, %v992_v1  ;;  %1309 = vmatpush.msra.mxu3 %v2735_v54  ;;  %v1402_v54 = vand.u32 4294901760, %v1401_v25  ;;  %v982_v25 = vld [vmem:[#allocation5 + $0xa0] sm:$0xff] }
 0x102   :  { %1240 = vmatpush.msra.mxu2 %v1047_v28  ;;  %v991_v28 = vld [vmem:[#allocation5 + $0xe8] sm:$0xff] }
 0x103   :  { %v2968_v16 = vsub.f32 %v992_v1, %v2961_v23  ;;  %v2970_v44 = vand.u32 4294901760, %v991_v28  ;;  %1342 = vmatpush.msrb.mxu0 %v2961_v23  ;;  %1311 = vmatpush.msra.mxu3 %v2739_v62 }
 0x104   :  { %1244 = vmatpush.msra.mxu2 %v1053_v46  ;;  %v1383_v46 = vsub.f32 %v2959_v58, %v1382_v35 }
 0x105   :  { %v1388_v52 = vand.u32 4294901760, %v2968_v16  ;;  %v2981_v29 = vsub.f32 %v991_v28, %v2970_v44  ;;  %1344 = vmatpush.msrb.mxu0 %v2970_v44  ;;  %v1407_v28 = vsub.f32 %v3009_v55, %v1406_v30  ;;  %1313 = vmatpush.msra.mxu3 %v2750_v14 }
 0x106   :  { %1248 = vmatpush.msra.mxu2 %v1059_v5  ;;  %v1384_v18 = vand.u32 4294901760, %v1383_v46  ;;  %v985_v46 = vld [vmem:[#allocation5 + $0xb8] sm:$0xff] }
 0x107   :  { %v1389_v5 = vsub.f32 %v2968_v16, %v1388_v52  ;;  %v1394_v61 = vand.u32 4294901760, %v2981_v29  ;;  %1346 = vmatpush.msrb.mxu0 %v2983_v59  ;;  %v1408_v38 = vand.u32 4294901760, %v1407_v28  ;;  %1315 = vmatpush.msra.mxu3 %v2771_v47  ;;  %v981_v28 = vld [vmem:[#allocation5 + $0x98] sm:$0xff] }
 0x108   :  { %1252 = vmatpush.msra.mxu2 %v1065_v8  ;;  %v988_v8 = vld [vmem:[#allocation5 + $0xd0] sm:$0xff]  ;;  %1385 = vmatpush.msrb.mxu1 %v1384_v18 }
 0x109   :  { %v1390_v24 = vand.u32 4294901760, %v1389_v5  ;;  %v1395_v34 = vsub.f32 %v2981_v29, %v1394_v61  ;;  %v3006_v4 = vand.u32 4294901760, %v988_v8  ;;  %1348 = vmatpush.msrb.mxu0 %v2998_v39  ;;  %v984_v5 = vld [vmem:[#allocation5 + $0xb0] sm:$0xff]  ;;  %1317 = vmatpush.msra.mxu3 %v2785_v7 }
 0x10a   :  { %1256 = vmatpush.msra.mxu2 %v1071_v26  ;;  %v987_v26 = vld [vmem:[#allocation5 + $0xc8] sm:$0xff] }
 0x10b   :  { %1391 = vmatpush.msrb.mxu1 %v1390_v24  ;;  %v1396_v32 = vand.u32 4294901760, %v1395_v34  ;;  %v3019_v42 = vsub.f32 %v988_v8, %v3006_v4  ;;  %v3022_v1 = vand.u32 4294901760, %v987_v26  ;;  %1350 = vmatpush.msrb.mxu0 %v3006_v4  ;;  %v3058_v8 = vand.u32 4294901760, %v984_v5  ;;  %v983_v34 = vld [vmem:[#allocation5 + $0xa8] sm:$0xff] }
 0x10c   :  { %1260 = vmatpush.msra.mxu2 %v1077_v3  ;;  %v3029_v3 = vand.u32 4294901760, %v986_v53  ;;  %1319 = vmatpush.msra.mxu3 %v2799_v60 }
 0x10d   :  { %1397 = vmatpush.msrb.mxu1 %v1396_v32  ;;  %v1412_v21 = vand.u32 4294901760, %v3019_v42  ;;  %v3035_v2 = vsub.f32 %v987_v26, %v3022_v1  ;;  %1352 = vmatpush.msrb.mxu0 %v3022_v1  ;;  %v3073_v26 = vand.u32 4294901760, %v983_v34 }
 0x10e   :  { %1264 = vmatpush.msra.mxu2 %v1083_v27  ;;  %v3045_v40 = vsub.f32 %v986_v53, %v3029_v3  ;;  %v3047_v27 = vand.u32 4294901760, %v985_v46  ;;  %1321 = vmatpush.msra.mxu3 %v2813_v49 }
 0x10f   :  { %1403 = vmatpush.msrb.mxu1 %v1402_v54  ;;  %v1413_v62 = vsub.f32 %v3019_v42, %v1412_v21  ;;  %v1418_v18 = vand.u32 4294901760, %v3035_v2  ;;  %1354 = vmatpush.msrb.mxu0 %v3029_v3  ;;  %v3084_v53 = vsub.f32 %v983_v34, %v3073_v26  ;;  %v3087_v54 = vand.u32 4294901760, %v982_v25 }
 0x110   :  { %1268 = vmatpush.msra.mxu2 %v1089_v20  ;;  %v1424_v37 = vand.u32 4294901760, %v3045_v40  ;;  %v3056_v20 = vsub.f32 %v985_v46, %v3047_v27  ;;  %v3096_v46 = vand.u32 4294901760, %v981_v28  ;;  %1323 = vmatpush.msra.mxu3 %v2825_v43 }
 0x111   :  { %v1414_v14 = vand.u32 4294901760, %v1413_v62  ;;  %1409 = vmatpush.msrb.mxu1 %v1408_v38  ;;  %v1419_v24 = vsub.f32 %v3035_v2, %v1418_v18  ;;  %1356 = vmatpush.msrb.mxu0 %v3047_v27  ;;  %v3100_v62 = vsub.f32 %v982_v25, %v3087_v54  ;;  %v980_v38 = vld [vmem:[#allocation5 + $0x90] sm:$0xff] }
 0x112   :  { %1272 = vmatpush.msra.mxu2 %v1095_v36  ;;  %v1425_v47 = vsub.f32 %v3045_v40, %v1424_v37  ;;  %v1430_v51 = vand.u32 4294901760, %v3056_v20  ;;  %v3071_v36 = vsub.f32 %v984_v5, %v3058_v8  ;;  %v3111_v5 = vand.u32 4294901760, %v980_v38  ;;  %1325 = vmatpush.msra.mxu3 %v2837_v63 }
 0x113   :  { %1415 = vmatpush.msrb.mxu1 %v1414_v14  ;;  %v1420_v32 = vand.u32 4294901760, %v1419_v24  ;;  %1358 = vmatpush.msrb.mxu0 %v3058_v8  ;;  %v1448_v14 = vand.u32 4294901760, %v3100_v62  ;;  %v979_v24 = vld [vmem:[#allocation5 + $0x88] sm:$0xff] }
 0x114   :  { %1276 = vmatpush.msra.mxu2 %v1101_v33  ;;  %v1426_v7 = vand.u32 4294901760, %v1425_v47  ;;  %v1431_v41 = vsub.f32 %v3056_v20, %v1430_v51  ;;  %v1436_v33 = vand.u32 4294901760, %v3071_v36  ;;  %v3122_v34 = vand.u32 4294901760, %v979_v24  ;;  %1327 = vmatpush.msra.mxu3 %v2849_v11 }
 0x115   :  { %1421 = vmatpush.msrb.mxu1 %v1420_v32  ;;  %1360 = vmatpush.msrb.mxu0 %v3073_v26  ;;  %v1449_v47 = vsub.f32 %v3100_v62, %v1448_v14  ;;  %v978_v32 = vld [vmem:[#allocation5 + $0x80] sm:$0xff] }
 0x116   :  { %1280 = vmatpush.msra.mxu2 %v1107_v45  ;;  %v1432_v60 = vand.u32 4294901760, %v1431_v41  ;;  %v1437_v12 = vsub.f32 %v3071_v36, %v1436_v33  ;;  %v1442_v45 = vand.u32 4294901760, %v3084_v53  ;;  %v3138_v25 = vand.u32 4294901760, %v978_v32  ;;  %1329 = vmatpush.msra.mxu3 %v2861_v17 }
 0x117   :  { %1427 = vmatpush.msrb.mxu1 %v1426_v7  ;;  %1362 = vmatpush.msrb.mxu0 %v3087_v54  ;;  %v1450_v7 = vand.u32 4294901760, %v1449_v47 }
 0x118   :  { %1284 = vmatpush.msra.mxu2 %v1113_v9  ;;  %v1438_v49 = vand.u32 4294901760, %v1437_v12  ;;  %v1443_v56 = vsub.f32 %v3084_v53, %v1442_v45  ;;  %v3109_v9 = vsub.f32 %v981_v28, %v3096_v46  ;;  %v3147_v41 = vsub.f32 %v978_v32, %v3138_v25  ;;  %1331 = vmatpush.msra.mxu3 %v2928_v19  ;;  %v272_v19 = vld [vmem:[%s3523_s4] sm:$0x3] }
 0x119   :  { %1433 = vmatpush.msrb.mxu1 %v1432_v60  ;;  %1364 = vmatpush.msrb.mxu0 %v3096_v46 }
 0x11a   :  { %1288 = vmatpush.msra.mxu2 %v1119_v6  ;;  %v1444_v43 = vand.u32 4294901760, %v1443_v56  ;;  %v1454_v57 = vand.u32 4294901760, %v3109_v9  ;;  %v3120_v6 = vsub.f32 %v980_v38, %v3111_v5  ;;  %v3531_v60 = vand.u32 4294901760, %v3147_v41  ;;  %1333 = vmatpush.msra.mxu3 %v2933_v50 }
 0x11b   :  { %1439 = vmatpush.msrb.mxu1 %v1438_v49  ;;  %1366 = vmatpush.msrb.mxu0 %v3111_v5  ;;  %v274_v56 = vperm.slane %v272_v19, 0 }
 0x11c   :  { %1292 = vmatpush.msra.mxu2 %v1125_v13  ;;  %v1455_v63 = vsub.f32 %v3109_v9, %v1454_v57  ;;  %v3533_v0 = vand.u32 4294901760, %v3120_v6  ;;  %v3136_v13 = vsub.f32 %v979_v24, %v3122_v34  ;;  %v1473_v38 = vsub.f32 %v3147_v41, %v3531_v60 }
 0x11d   :  { %1445 = vmatpush.msrb.mxu1 %v1444_v43  ;;  %1368 = vmatpush.msrb.mxu0 %v3122_v34 }
 0x11e   :  { %1296 = vmatpush.msra.mxu2 %v1131_v22  ;;  %v1456_v10 = vand.u32 4294901760, %v1455_v63  ;;  %v1461_v11 = vsub.f32 %v3120_v6, %v3533_v0  ;;  %v3532_v22 = vand.u32 4294901760, %v3136_v13  ;;  %v1474_v49 = vand.u32 4294901760, %v1473_v38 }
 0x11f   :  { %1451 = vmatpush.msrb.mxu1 %v1450_v7  ;;  %1370 = vmatpush.msrb.mxu0 %v3138_v25 }
 0x120   :  { %v1462_v28 = vand.u32 4294901760, %v1461_v11  ;;  %v1467_v17 = vsub.f32 %v3136_v13, %v3532_v22 }
 0x121   :  { %1457 = vmatpush.msrb.mxu1 %v1456_v10 }
 0x122   :  { %v1468_v12 = vand.u32 4294901760, %v1467_v17 }
 0x123   :  { %1463 = vmatpush.msrb.mxu1 %v1462_v28 }
 0x125   :  { %1469 = vmatpush.msrb.mxu1 %v1468_v12  ;;  %v275_v12 = vperm.slane %v272_v19, 1 }
 0x127   :  { %1475 = vmatpush.msrb.mxu1 %v1474_v49 }
 0x134   :  { %v471_v63 = vpop.f32.mrf.mxu0 }
 0x136   :  { %v510_v7 = vpop.f32.mrf.mxu1 }
 0x138   :  { %v417_v47 = vpop.f32.mrf.mxu3 }
 0x13d   :  { %v657_v49 = vpop.f32.mrf.mxu0 }
 0x140   :  { %v316_v24 = vpop.f32.mrf.mxu2 }
 0x141   :  { %v317_v43 = vadd.f32 %v316_v24, %v274_v56  ;;  %v616_v60 = vpop.f32.mrf.mxu3 }
 0x143   :  { %v418_v32 = vadd.f32 %v417_v47, %v317_v43  ;;  %v658_v43 = vadd.f32 %v657_v49, %v275_v12 }
 0x145   :  { %v472_v50 = vadd.f32 %v471_v63, %v418_v32 }
 0x147   :  { %v511_v10 = vadd.f32 %v510_v7, %v472_v50  ;;  %v1689_v50 = vld [vmem:[%s3526_s7 + $0x40] sm:$0xff] }
 0x14a   :  { %v579_v11 = vpop.f32.mrf.mxu2 }
 0x14b   :  { %v580_v17 = vadd.f32 %v579_v11, %v511_v10 }
 0x14d   :  { %v617_v28 = vadd.f32 %v616_v60, %v580_v17  ;;  %v758_v60 = vpop.f32.mrf.mxu1  ;;  %v3336_v17 = vand.u32 4294901760, %v1689_v50 }
 0x14e   :  { %v759_v19 = vadd.f32 %v758_v60, %v658_v43  ;;  %v1687_v60 = vld [vmem:[%s3526_s7 + $0x30] sm:$0xff] }
 0x14f   :  { %2073 = vtanh.f32 %v617_v28 }
 0x155   :  { %v2074_v38 = vpop.eup %2073 }
 0x156   :  { %v1030_v22 = vand.u32 4294901760, %v2074_v38 }
 0x158   :  { %1136 = vmatmul.f32.vlgmr.msrb.gmra.mxu3 %v1030_v22  ;;  %v1031_v0 = vsub.f32 %v2074_v38, %v1030_v22  ;;  %v1688_v38 = vld [vmem:[%s3526_s7 + $0x38] sm:$0xff] }
 0x159   :  { %1536 = vmatpush.msrb.mxu3 %v2950_v15 }
 0x15a   :  { %1190 = vmatmul.f32.vlgmr.msra.gmra.mxu0 %v1031_v0  ;;  %v1032_v56 = vand.u32 4294901760, %v1031_v0 }
 0x15b   :  { %1538 = vmatpush.msrb.mxu3 %v2961_v23  ;;  %1577 = vmatpush.msra.mxu0 %v1382_v35 }
 0x15c   :  { %1229 = vmatmul.f32.vlgmr.msra.gmra.mxu1 %v1032_v56  ;;  %v1033_v24 = vsub.f32 %v1031_v0, %v1032_v56  ;;  %v3352_v56 = vsub.f32 %v1689_v50, %v3336_v17 }
 0x15d   :  { %1540 = vmatpush.msrb.mxu3 %v2970_v44  ;;  %1644 = vmatpush.msra.mxu1 %v2950_v15 }
 0x15e   :  { %v1034_v47 = vand.u32 4294901760, %v1033_v24  ;;  %1581 = vmatpush.msra.mxu0 %v1388_v52  ;;  %v851_v52 = vpop.f32.mrf.mxu3  ;;  %v3354_v24 = vand.u32 4294901760, %v1688_v38 }
 0x15f   :  { %1542 = vmatpush.msrb.mxu3 %v2983_v59  ;;  %1646 = vmatpush.msra.mxu1 %v2961_v23  ;;  %v920_v23 = vpop.f32.mrf.mxu0 }
 0x160   :  { %1035 = vmatmul.f32.vlgmr.msrb.gmra.mxu2 %v1034_v47  ;;  %1335 = vmatmul.f32.vlgmr.msra.gmra.mxu3 %v1030_v22 }
 0x161   :  { %1483 = vmatpush.msrb.mxu2 %v2959_v58  ;;  %1544 = vmatpush.msrb.mxu3 %v2998_v39 }
 0x162   :  { %1648 = vmatpush.msra.mxu1 %v2970_v44  ;;  %v812_v35 = vpop.f32.mrf.mxu2  ;;  %1585 = vmatpush.msra.mxu0 %v1394_v61  ;;  %v957_v44 = vpop.f32.mrf.mxu1 }
 0x163   :  { %v813_v15 = vadd.f32 %v812_v35, %v759_v19  ;;  %1486 = vmatpush.msrb.mxu2 %v2968_v16  ;;  %1546 = vmatpush.msrb.mxu3 %v3006_v4  ;;  %v1786_v35 = vand.u32 4294901760, %v3352_v56 }
 0x164   :  { %1650 = vmatpush.msra.mxu1 %v2983_v59  ;;  %1589 = vmatpush.msra.mxu0 %v1400_v48 }
 0x165   :  { %v852_v58 = vadd.f32 %v851_v52, %v813_v15  ;;  %1489 = vmatpush.msrb.mxu2 %v2981_v29  ;;  %1548 = vmatpush.msrb.mxu3 %v3022_v1  ;;  %v3367_v15 = vsub.f32 %v1688_v38, %v3354_v24  ;;  %v3370_v52 = vand.u32 4294901760, %v1687_v60 }
 0x166   :  { %1652 = vmatpush.msra.mxu1 %v2998_v39  ;;  %1593 = vmatpush.msra.mxu0 %v1406_v30  ;;  %v3538_v30 = vand.u32 4294901760, %v3147_v41 }
 0x167   :  { %v921_v16 = vadd.f32 %v920_v23, %v852_v58  ;;  %1492 = vmatpush.msrb.mxu2 %v2994_v31  ;;  %1550 = vmatpush.msrb.mxu3 %v3029_v3  ;;  %v1686_v58 = vld [vmem:[%s3526_s7 + $0x28] sm:$0xff] }
 0x168   :  { %1654 = vmatpush.msra.mxu1 %v3006_v4  ;;  %1298 = vmatmul.f32.vlgmr.msra.gmra.mxu2 %v1030_v22 }
 0x169   :  { %v958_v59 = vadd.f32 %v957_v44, %v921_v16  ;;  %1495 = vmatpush.msrb.mxu2 %v3009_v55  ;;  %1552 = vmatpush.msrb.mxu3 %v3047_v27  ;;  %v3536_v55 = vand.u32 4294901760, %v3120_v6  ;;  %v1787_v16 = vsub.f32 %v3352_v56, %v1786_v35  ;;  %v1792_v44 = vand.u32 4294901760, %v3367_v15 }
 0x16a   :  { %1656 = vmatpush.msra.mxu1 %v3022_v1  ;;  %1597 = vmatpush.msra.mxu0 %v1412_v21  ;;  %v1696_v1 = vld [vmem:[%s3526_s7 + $0x78] sm:$0xff] }
 0x16b   :  { %2075 = vtanh.f32 %v958_v59  ;;  %1498 = vmatpush.msrb.mxu2 %v3019_v42  ;;  %1554 = vmatpush.msrb.mxu3 %v3058_v8  ;;  %v3537_v42 = vand.u32 4294901760, %v3136_v13  ;;  %v3246_v21 = vand.u32 4294901760, %v1696_v1  ;;  %v3380_v59 = vand.u32 4294901760, %v1686_v58 }
 0x16c   :  { %1658 = vmatpush.msra.mxu1 %v3029_v3  ;;  %1601 = vmatpush.msra.mxu0 %v1418_v18  ;;  %v1695_v3 = vld [vmem:[%s3526_s7 + $0x70] sm:$0xff] }
 0x16d   :  { %1501 = vmatpush.msrb.mxu2 %v3035_v2  ;;  %1556 = vmatpush.msrb.mxu3 %v3073_v26  ;;  %v3252_v2 = vsub.f32 %v1696_v1, %v3246_v21 }
 0x16e   :  { %1660 = vmatpush.msra.mxu1 %v3047_v27  ;;  %1605 = vmatpush.msra.mxu0 %v1424_v37  ;;  %v1694_v27 = vld [vmem:[%s3526_s7 + $0x68] sm:$0xff] }
 0x16f   :  { %1504 = vmatpush.msrb.mxu2 %v3045_v40  ;;  %1558 = vmatpush.msrb.mxu3 %v3087_v54  ;;  %v3254_v40 = vand.u32 4294901760, %v1695_v3  ;;  %v1744_v18 = vand.u32 4294901760, %v3252_v2 }
 0x170   :  { %1662 = vmatpush.msra.mxu1 %v3058_v8  ;;  %1609 = vmatpush.msra.mxu0 %v1430_v51  ;;  %v1693_v8 = vld [vmem:[%s3526_s7 + $0x60] sm:$0xff] }
 0x171   :  { %v2076_v29 = vpop.eup %2075  ;;  %1507 = vmatpush.msrb.mxu2 %v3056_v20  ;;  %1560 = vmatpush.msrb.mxu3 %v3096_v46  ;;  %v3263_v37 = vsub.f32 %v1695_v3, %v3254_v40  ;;  %v3265_v20 = vand.u32 4294901760, %v1694_v27  ;;  %v1745_v51 = vsub.f32 %v3252_v2, %v1744_v18 }
 0x172   :  { %1664 = vmatpush.msra.mxu1 %v3073_v26  ;;  %v1371_v61 = vand.u32 4294901760, %v2076_v29  ;;  %1613 = vmatpush.msra.mxu0 %v1436_v33  ;;  %v3280_v33 = vand.u32 4294901760, %v1693_v8 }
 0x173   :  { %1510 = vmatpush.msrb.mxu2 %v3071_v36  ;;  %1562 = vmatpush.msrb.mxu3 %v3111_v5  ;;  %v1750_v36 = vand.u32 4294901760, %v3263_v37  ;;  %v3278_v26 = vsub.f32 %v1694_v27, %v3265_v20 }
 0x174   :  { %1666 = vmatpush.msra.mxu1 %v3087_v54  ;;  %v1372_v31 = vsub.f32 %v2076_v29, %v1371_v61  ;;  %1617 = vmatpush.msra.mxu0 %v1442_v45  ;;  %v1746_v54 = vand.u32 4294901760, %v1745_v51  ;;  %v3385_v29 = vsub.f32 %v1687_v60, %v3370_v52  ;;  %v1683_v51 = vld [vmem:[%s3526_s7 + $0x10] sm:$0xff] }
 0x175   :  { %1477 = vmatmul.f32.vlgmr.msrb.gmra.mxu1 %v1371_v61  ;;  %1513 = vmatpush.msrb.mxu2 %v3084_v53  ;;  %v1692_v53 = vld [vmem:[%s3526_s7 + $0x58] sm:$0xff]  ;;  %v1751_v45 = vsub.f32 %v3263_v37, %v1750_v36 }
 0x176   :  { %1564 = vmatpush.msrb.mxu3 %v3122_v34  ;;  %1668 = vmatpush.msra.mxu1 %v3096_v46  ;;  %v1373_v39 = vand.u32 4294901760, %v1372_v31  ;;  %v1756_v46 = vand.u32 4294901760, %v3278_v26 }
 0x177   :  { %1516 = vmatpush.msrb.mxu2 %v3100_v62  ;;  %1621 = vmatpush.msra.mxu0 %v1448_v14  ;;  %v3293_v62 = vsub.f32 %v1693_v8, %v3280_v33  ;;  %v1752_v14 = vand.u32 4294901760, %v1751_v45 }
 0x178   :  { %1566 = vmatpush.msrb.mxu3 %v3138_v25  ;;  %1670 = vmatpush.msra.mxu1 %v3111_v5  ;;  %v1374_v48 = vsub.f32 %v1372_v31, %v1373_v39  ;;  %v1691_v5 = vld [vmem:[%s3526_s7 + $0x50] sm:$0xff] }
 0x179   :  { %1570 = vmatmul.f32.vlgmr.msrb.gmra.mxu3 %v1373_v39  ;;  %1519 = vmatpush.msrb.mxu2 %v3109_v9  ;;  %v3297_v9 = vand.u32 4294901760, %v1692_v53  ;;  %v1793_v39 = vsub.f32 %v3367_v15, %v1792_v44 }
 0x17a   :  { %1672 = vmatpush.msra.mxu1 %v3122_v34  ;;  %v1375_v4 = vand.u32 4294901760, %v1374_v48  ;;  %1625 = vmatpush.msra.mxu0 %v1454_v57  ;;  %v1757_v57 = vsub.f32 %v3278_v26, %v1756_v46  ;;  %v3307_v34 = vand.u32 4294901760, %v1691_v5  ;;  %v3395_v48 = vsub.f32 %v1686_v58, %v3380_v59 }
 0x17b   :  { %1522 = vmatpush.msrb.mxu2 %v3120_v6  ;;  %1747 = vmatpush.msra.mxu3 %v1746_v54  ;;  %v1762_v6 = vand.u32 4294901760, %v3293_v62  ;;  %v3311_v0 = vsub.f32 %v1692_v53, %v3297_v9 }
 0x17c   :  { %1674 = vmatpush.msra.mxu1 %v3138_v25  ;;  %1376 = vmatmul.f32.vlgmr.msrb.gmra.mxu0 %v1375_v4  ;;  %v1758_v25 = vand.u32 4294901760, %v1757_v57  ;;  %v1804_v1 = vand.u32 4294901760, %v3395_v48  ;;  %v1682_v57 = vld [vmem:[%s3526_s7 + $0x8] sm:$0xff] }
 0x17d   :  { %1676 = vmatmul.f32.vlgmr.msra.gmra.mxu1 %v1371_v61  ;;  %1525 = vmatpush.msrb.mxu2 %v3136_v13  ;;  %v1690_v13 = vld [vmem:[%s3526_s7 + $0x48] sm:$0xff]  ;;  %v1763_v22 = vsub.f32 %v3293_v62, %v1762_v6  ;;  %v1768_v63 = vand.u32 4294901760, %v3311_v0 }
 0x17e   :  { %1629 = vmatpush.msra.mxu0 %v3536_v55  ;;  %1898 = vmatpush.msrb.mxu1 %v3246_v21  ;;  %v3324_v32 = vand.u32 4294901760, %v1690_v13  ;;  %v1798_v55 = vand.u32 4294901760, %v3385_v29  ;;  %v1805_v53 = vsub.f32 %v3395_v48, %v1804_v1 }
 0x17f   :  { %1528 = vmatpush.msrb.mxu2 %v3147_v41  ;;  %1753 = vmatpush.msra.mxu3 %v1752_v14  ;;  %v3322_v41 = vsub.f32 %v1691_v5, %v3307_v34  ;;  %v1764_v7 = vand.u32 4294901760, %v1763_v22  ;;  %v1769_v28 = vsub.f32 %v3311_v0, %v1768_v63  ;;  %v3428_v5 = vand.u32 4294901760, %v1683_v51 }
 0x180   :  { %1531 = vmatmul.f32.vlgmr.msrb.gmra.mxu2 %v1372_v31  ;;  %1633 = vmatpush.msra.mxu0 %v3537_v42  ;;  %v3334_v11 = vsub.f32 %v1690_v13, %v3324_v32  ;;  %v1788_v31 = vand.u32 4294901760, %v1787_v16  ;;  %v1684_v42 = vld [vmem:[%s3526_s7 + $0x18] sm:$0xff]  ;;  %v1799_v8 = vsub.f32 %v3385_v29, %v1798_v55  ;;  %v1806_v13 = vand.u32 4294901760, %v1805_v53 }
 0x181   :  { %1702 = vmatpush.msra.mxu2 %v3246_v21  ;;  %1900 = vmatpush.msrb.mxu1 %v3254_v40  ;;  %v1774_v10 = vand.u32 4294901760, %v3322_v41  ;;  %v1770_v43 = vand.u32 4294901760, %v1769_v28  ;;  %v3410_v27 = vand.u32 4294901760, %v1684_v42  ;;  %v3441_v50 = vsub.f32 %v1683_v51, %v3428_v5  ;;  %v1681_v28 = vld [vmem:[%s3526_s7] sm:$0xff] }
 0x182   :  { %1637 = vmatpush.msra.mxu0 %v3538_v30  ;;  %1759 = vmatpush.msra.mxu3 %v1758_v25  ;;  %v1780_v49 = vand.u32 4294901760, %v3334_v11  ;;  %v1794_v30 = vand.u32 4294901760, %v1793_v39  ;;  %v1800_v14 = vand.u32 4294901760, %v1799_v8  ;;  %v3455_v60 = vand.u32 4294901760, %v1681_v28 }
 0x183   :  { %1704 = vmatpush.msra.mxu2 %v3254_v40  ;;  %1902 = vmatpush.msrb.mxu1 %v3265_v20  ;;  %v1775_v12 = vsub.f32 %v3322_v41, %v1774_v10  ;;  %v3426_v45 = vsub.f32 %v1684_v42, %v3410_v27 }
 0x184   :  { %1639 = vmatmul.f32.vlgmr.msra.gmra.mxu0 %v1371_v61  ;;  %1765 = vmatpush.msra.mxu3 %v1764_v7  ;;  %v1781_v19 = vsub.f32 %v3334_v11, %v1780_v49  ;;  %v1685_v61 = vld [vmem:[%s3526_s7 + $0x20] sm:$0xff]  ;;  %v3445_v7 = vand.u32 4294901760, %v1682_v57 }
 0x185   :  { %1845 = vmatpush.msrb.mxu0 %v3252_v2  ;;  %1706 = vmatpush.msra.mxu2 %v3265_v20  ;;  %v1776_v47 = vand.u32 4294901760, %v1775_v12  ;;  %v3397_v4 = vand.u32 4294901760, %v1685_v61  ;;  %v1816_v22 = vand.u32 4294901760, %v3426_v45  ;;  %v2069_v2 = vld [vmem:[%s3525_s6] ss:$0 sm:$0xff] }
 0x186   :  { %1904 = vmatpush.msrb.mxu1 %v3280_v33  ;;  %1771 = vmatpush.msra.mxu3 %v1770_v43  ;;  %v1782_v23 = vand.u32 4294901760, %v1781_v19  ;;  %v1822_v43 = vand.u32 4294901760, %v3441_v50 }
 0x187   :  { %1848 = vmatpush.msrb.mxu0 %v3263_v37  ;;  %1708 = vmatpush.msra.mxu2 %v3280_v33  ;;  %v3408_v3 = vsub.f32 %v1685_v61, %v3397_v4  ;;  %v1817_v12 = vsub.f32 %v3426_v45, %v1816_v22 }
 0x188   :  { %1906 = vmatpush.msrb.mxu1 %v3297_v9  ;;  %1777 = vmatpush.msra.mxu3 %v1776_v47  ;;  %v1827_v47 = vsub.f32 %v1682_v57, %v3445_v7  ;;  %v1823_v58 = vsub.f32 %v3441_v50, %v1822_v43 }
 0x189   :  { %1851 = vmatpush.msrb.mxu0 %v3278_v26  ;;  %1710 = vmatpush.msra.mxu2 %v3297_v9  ;;  %v1810_v54 = vand.u32 4294901760, %v3408_v3  ;;  %v1818_v19 = vand.u32 4294901760, %v1817_v12 }
 0x18a   :  { %1908 = vmatpush.msrb.mxu1 %v3307_v34  ;;  %1783 = vmatpush.msra.mxu3 %v1782_v23  ;;  %v1833_v23 = vsub.f32 %v1681_v28, %v3455_v60  ;;  %v1828_v16 = vand.u32 4294901760, %v1827_v47  ;;  %v1824_v61 = vand.u32 4294901760, %v1823_v58 }
 0x18b   :  { %1854 = vmatpush.msrb.mxu0 %v3293_v62  ;;  %1712 = vmatpush.msra.mxu2 %v3307_v34  ;;  %v1811_v25 = vsub.f32 %v3408_v3, %v1810_v54 }
 0x18c   :  { %1910 = vmatpush.msrb.mxu1 %v3324_v32  ;;  %1789 = vmatpush.msra.mxu3 %v1788_v31  ;;  %v1834_v31 = vand.u32 4294901760, %v1833_v23  ;;  %v1829_v39 = vsub.f32 %v1827_v47, %v1828_v16 }
 0x18d   :  { %1857 = vmatpush.msrb.mxu0 %v3311_v0  ;;  %1714 = vmatpush.msra.mxu2 %v3324_v32  ;;  %v1812_v38 = vand.u32 4294901760, %v1811_v25 }
 0x18e   :  { %1912 = vmatpush.msrb.mxu1 %v3336_v17  ;;  %1795 = vmatpush.msra.mxu3 %v1794_v30  ;;  %v1835_v42 = vsub.f32 %v1833_v23, %v1834_v31  ;;  %v1830_v30 = vand.u32 4294901760, %v1829_v39 }
 0x18f   :  { %1860 = vmatpush.msrb.mxu0 %v3322_v41  ;;  %1716 = vmatpush.msra.mxu2 %v3336_v17 }
 0x190   :  { %1914 = vmatpush.msrb.mxu1 %v3354_v24  ;;  %1801 = vmatpush.msra.mxu3 %v1800_v14  ;;  %v1836_v8 = vand.u32 4294901760, %v1835_v42 }
 0x191   :  { %1863 = vmatpush.msrb.mxu0 %v3334_v11  ;;  %1718 = vmatpush.msra.mxu2 %v3354_v24 }
 0x192   :  { %1916 = vmatpush.msrb.mxu1 %v3370_v52  ;;  %1807 = vmatpush.msra.mxu3 %v1806_v13 }
 0x193   :  { %1866 = vmatpush.msrb.mxu0 %v3352_v56  ;;  %1720 = vmatpush.msra.mxu2 %v3370_v52 }
 0x194   :  { %1918 = vmatpush.msrb.mxu1 %v3380_v59  ;;  %1813 = vmatpush.msra.mxu3 %v1812_v38 }
 0x195   :  { %1869 = vmatpush.msrb.mxu0 %v3367_v15  ;;  %1722 = vmatpush.msra.mxu2 %v3380_v59 }
 0x196   :  { %1920 = vmatpush.msrb.mxu1 %v3397_v4  ;;  %1819 = vmatpush.msra.mxu3 %v1818_v19 }
 0x197   :  { %1872 = vmatpush.msrb.mxu0 %v3385_v29  ;;  %1724 = vmatpush.msra.mxu2 %v3397_v4 }
 0x198   :  { %1922 = vmatpush.msrb.mxu1 %v3410_v27  ;;  %1825 = vmatpush.msra.mxu3 %v1824_v61 }
 0x199   :  { %1875 = vmatpush.msrb.mxu0 %v3395_v48  ;;  %1726 = vmatpush.msra.mxu2 %v3410_v27 }
 0x19a   :  { %1924 = vmatpush.msrb.mxu1 %v3428_v5  ;;  %1831 = vmatpush.msra.mxu3 %v1830_v30 }
 0x19b   :  { %1878 = vmatpush.msrb.mxu0 %v3408_v3  ;;  %1728 = vmatpush.msra.mxu2 %v3428_v5 }
 0x19c   :  { %1926 = vmatpush.msrb.mxu1 %v3445_v7  ;;  %1837 = vmatpush.msra.mxu3 %v1836_v8 }
 0x19d   :  { %1881 = vmatpush.msrb.mxu0 %v3426_v45  ;;  %1730 = vmatpush.msra.mxu2 %v3445_v7 }
 0x19e   :  { %1928 = vmatpush.msrb.mxu1 %v3455_v60  ;;  %2006 = vmatpush.msrb.mxu3 %v3246_v21 }
 0x19f   :  { %1884 = vmatpush.msrb.mxu0 %v3441_v50  ;;  %1732 = vmatpush.msra.mxu2 %v3455_v60 }
 0x1a0   :  { %2008 = vmatpush.msrb.mxu3 %v3254_v40 }
 0x1a1   :  { %1939 = vmatpush.msrb.mxu2 %v1744_v18  ;;  %1887 = vmatpush.msrb.mxu0 %v1827_v47 }
 0x1a2   :  { %2010 = vmatpush.msrb.mxu3 %v3265_v20 }
 0x1a3   :  { %1943 = vmatpush.msrb.mxu2 %v1750_v36  ;;  %1890 = vmatpush.msrb.mxu0 %v1833_v23 }
 0x1a4   :  { %2012 = vmatpush.msrb.mxu3 %v3280_v33 }
 0x1a5   :  { %1947 = vmatpush.msrb.mxu2 %v1756_v46 }
 0x1a6   :  { %2014 = vmatpush.msrb.mxu3 %v3297_v9 }
 0x1a7   :  { %1951 = vmatpush.msrb.mxu2 %v1762_v6 }
 0x1a8   :  { %2016 = vmatpush.msrb.mxu3 %v3307_v34 }
 0x1a9   :  { %1955 = vmatpush.msrb.mxu2 %v1768_v63 }
 0x1aa   :  { %2018 = vmatpush.msrb.mxu3 %v3324_v32 }
 0x1ab   :  { %1959 = vmatpush.msrb.mxu2 %v1774_v10 }
 0x1ac   :  { %2020 = vmatpush.msrb.mxu3 %v3336_v17 }
 0x1ad   :  { %1963 = vmatpush.msrb.mxu2 %v1780_v49 }
 0x1ae   :  { %2022 = vmatpush.msrb.mxu3 %v3354_v24 }
 0x1af   :  { %1967 = vmatpush.msrb.mxu2 %v1786_v35 }
 0x1b0   :  { %2024 = vmatpush.msrb.mxu3 %v3370_v52 }
 0x1b1   :  { %1971 = vmatpush.msrb.mxu2 %v1792_v44 }
 0x1b2   :  { %2026 = vmatpush.msrb.mxu3 %v3380_v59 }
 0x1b3   :  { %1975 = vmatpush.msrb.mxu2 %v1798_v55 }
 0x1b4   :  { %2028 = vmatpush.msrb.mxu3 %v3397_v4  ;;  %v2070_v4 = vld [vmem:[%s3527_s8] ss:$0 sm:$0xff] }
 0x1b5   :  { %1979 = vmatpush.msrb.mxu2 %v1804_v1 }
 0x1b6   :  { %2030 = vmatpush.msrb.mxu3 %v3410_v27 }
 0x1b7   :  { %1983 = vmatpush.msrb.mxu2 %v1810_v54 }
 0x1b8   :  { %2032 = vmatpush.msrb.mxu3 %v3428_v5 }
 0x1b9   :  { %1987 = vmatpush.msrb.mxu2 %v1816_v22 }
 0x1ba   :  { %2034 = vmatpush.msrb.mxu3 %v3445_v7 }
 0x1bb   :  { %1991 = vmatpush.msrb.mxu2 %v1822_v43 }
 0x1bc   :  { %2036 = vmatpush.msrb.mxu3 %v3455_v60 }
 0x1bd   :  { %1995 = vmatpush.msrb.mxu2 %v1828_v16 }
 0x1bf   :  { %1999 = vmatpush.msrb.mxu2 %v1834_v31 }
 0x1d7   :  { %v1191_v20 = vpop.f32.mrf.mxu0 }
 0x1d9   :  { %v1230_v26 = vpop.f32.mrf.mxu1 }
 0x1db   :  { %v1137_v40 = vpop.f32.mrf.mxu3 }
 0x1e3   :  { %v1036_v18 = vpop.f32.mrf.mxu2  ;;  %v1336_v9 = vpop.f32.mrf.mxu3 }
 0x1e4   :  { %v1037_v21 = vadd.f32 %v2069_v2, %v1036_v18 }
 0x1e6   :  { %v1138_v37 = vadd.f32 %v1137_v40, %v1037_v21 }
 0x1e8   :  { %v1192_v36 = vadd.f32 %v1191_v20, %v1138_v37 }
 0x1ea   :  { %v1231_v33 = vadd.f32 %v1230_v26, %v1192_v36 }
 0x1eb   :  { %v1299_v46 = vpop.f32.mrf.mxu2 }
 0x1ec   :  { %v1300_v62 = vadd.f32 %v1299_v46, %v1231_v33 }
 0x1ee   :  { %v1337_v34 = vadd.f32 %v1336_v9, %v1300_v62 }
 0x1f2   :  { %v1478_v41 = vpop.f32.mrf.mxu1 }
 0x1f9   :  { %v1377_v6 = vpop.f32.mrf.mxu0 }
 0x1fa   :  { %v1378_v0 = vadd.f32 %v1377_v6, %v1337_v34  ;;  %v1677_v24 = vpop.f32.mrf.mxu1 }
 0x1fc   :  { %v1479_v32 = vadd.f32 %v1478_v41, %v1378_v0  ;;  %v1571_v11 = vpop.f32.mrf.mxu3 }
 0x201   :  { %v1640_v49 = vpop.f32.mrf.mxu0 }
 0x203   :  { %v1532_v63 = vpop.f32.mrf.mxu2 }
 0x204   :  { %v1533_v10 = vadd.f32 %v1532_v63, %v1479_v32 }
 0x206   :  { %v1572_v17 = vadd.f32 %v1571_v11, %v1533_v10 }
 0x208   :  { %v1641_v56 = vadd.f32 %v1640_v49, %v1572_v17 }
 0x20a   :  { %v1678_v35 = vadd.f32 %v1677_v24, %v1641_v56 }
 0x20c   :  { %2077 = vtanh.f32 %v1678_v35 }
 0x212   :  { %v2078_v15 = vpop.eup %2077 }
 0x213   :  { %v1733_v52 = vand.u32 4294901760, %v2078_v15 }
 0x215   :  { %1839 = vmatmul.f32.vlgmr.msra.gmra.mxu3 %v1733_v52  ;;  %v1734_v44 = vsub.f32 %v2078_v15, %v1733_v52 }
 0x217   :  { %1893 = vmatmul.f32.vlgmr.msrb.gmra.mxu0 %v1734_v44  ;;  %v1735_v59 = vand.u32 4294901760, %v1734_v44 }
 0x219   :  { %1932 = vmatmul.f32.vlgmr.msrb.gmra.mxu1 %v1735_v59  ;;  %v1736_v29 = vsub.f32 %v1734_v44, %v1735_v59 }
 0x21b   :  { %v1737_v48 = vand.u32 4294901760, %v1736_v29 }
 0x21d   :  { %1738 = vmatmul.f32.vlgmr.msra.gmra.mxu2 %v1737_v48  ;;  %2038 = vmatmul.f32.vlgmr.msrb.gmra.mxu3 %v1733_v52 }
 0x225   :  { %2001 = vmatmul.f32.vlgmr.msrb.gmra.mxu2 %v1733_v52 }
 0x294   :  { %v1894_v51 = vpop.f32.mrf.mxu0 }
 0x296   :  { %v1933_v54 = vpop.f32.mrf.mxu1 }
 0x298   :  { %v1840_v55 = vpop.f32.mrf.mxu3 }
 0x2a0   :  { %v1739_v1 = vpop.f32.mrf.mxu2  ;;  %v2039_v57 = vpop.f32.mrf.mxu3 }
 0x2a1   :  { %v1740_v3 = vadd.f32 %v2070_v4, %v1739_v1 }
 0x2a3   :  { %v1841_v27 = vadd.f32 %v1840_v55, %v1740_v3 }
 0x2a5   :  { %v1895_v53 = vadd.f32 %v1894_v51, %v1841_v27 }
 0x2a7   :  { %v1934_v45 = vadd.f32 %v1933_v54, %v1895_v53 }
 0x2a8   :  { %v2002_v5 = vpop.f32.mrf.mxu2 }
 0x2a9   :  { %v2003_v14 = vadd.f32 %v2002_v5, %v1934_v45 }
 0x2ab   :  { %v2040_v13 = vadd.f32 %v2039_v57, %v2003_v14 }
 0x2ad   :  { %2042 = vst.msk [vmem:[#allocation7] sm:$0xff] %vm72_vm1, %v2040_v13 }
 0x2ae   :  { %2053 = dma.vmem_to_hbm [thread:$0]  %s2049_s14, 128, %s2051_s17, [#allocation4]  }
 0x2af   :  { %2155 = dma.done.wait [#allocation4], 128  }
 0x2b0   :  { %2156 = vsyncadd [#allocation4], 4294967168 }
 0x2b1   :  { %2058 = vsyncpa [#allocation3], 1 }
 0x2b2   :  { %2059 = vsyncpa [#allocation6], 1 }
 0x2b3   :  { %2060 = vsyncpa [#allocation4], 1 }

</bundles_post_ra>
